<compile_context>
chip_gen: v7x
topology: tpu7x:2x2x1
jax: 0.10.0
libtpu: 0.0.40
codegen_flags: <defaults>
</compile_context>

<pallas_src>
import functools

import jax
import jax.numpy as jnp
import numpy as np
from jax import lax
from jax.experimental import pallas as pl
from jax.experimental.pallas import tpu as pltpu


# ------------------------------ helpers ------------------------------------ #

def _round_up(v, m):
    return (v + m - 1) // m * m


def _fold_bn(gamma, beta, mean, var, eps=1e-5):
    s = gamma / jnp.sqrt(var + eps)
    b = beta - mean * s
    return s.reshape(1, -1), b.reshape(1, -1)


def _vmem_capacity_bytes():
    try:
        return int(pltpu.get_tpu_info().vmem_capacity_bytes)
    except Exception:
        return 64 << 20                      # conservative: v7x per-TC VMEM


def _vmem_bytes(th_o, *, stride, H, W, Cin, Wo, oup, hidden_p, has_expand,
                x_itemsize, out_itemsize, w_itemsize, scratch_itemsize):
    """Approximate total VMEM footprint for one grid step (with pipelining)."""
    n_prows = th_o + 2 if stride == 1 else 2 * th_o + 1
    scratch = (n_prows * (W + 2) + th_o * Wo) * hidden_p * scratch_itemsize
    x_blk = 2 * H * W * Cin * x_itemsize                 # double-buffered input
    o_blk = 2 * th_o * Wo * oup * out_itemsize           # double-buffered output
    w_elems = Cin * hidden_p + 9 * hidden_p + 2 * hidden_p + hidden_p * oup + oup
    if has_expand:
        w_elems += hidden_p                               # b1
    w_blk = 2 * w_elems * w_itemsize
    return scratch + x_blk + o_blk + w_blk


def _pick_row_tile(Ho, need_fn, *, budget_bytes, max_tile=16):
    """Largest divisor of Ho (capped for unroll size) whose footprint fits."""
    best = 1
    for d in range(1, Ho + 1):
        if Ho % d or d > max_tile:
            continue
        if need_fn(d) <= budget_bytes:
            best = d
    return best


# ------------------------------ fused kernel ------------------------------- #

def _make_fused_kernel(*, stride, has_expand, use_res, H, W, Cin, hidden_p,
                       oup, th_o, scratch_dtype):
    """Fused expand -> dw3x3 -> project(+res) kernel for one (batch, row block)."""
    Wo = W // stride
    P = Wo + 1                                 # phase stride (stride-2 layout)
    n_prows = th_o + 2 if stride == 1 else 2 * th_o + 1
    n_main = th_o * stride                     # main input rows per block

    def kernel(*refs):
        i = 0
        x_ref = refs[i]; i += 1
        we_ref = refs[i]; i += 1
        if has_expand:
            b1_ref = refs[i]; i += 1
        wd_ref, b2_ref, wp_ref, b3_ref = refs[i:i + 4]; i += 4
        o_ref = refs[i]; i += 1
        epad_ref, dw_ref = refs[i], refs[i + 1]

        r = pl.program_id(1)
        num_r = pl.num_programs(1)
        ho0 = r * th_o
        row0 = pl.multiple_of(ho0 * stride, n_main)      # first main input row

        # ---- expand (1x1 conv + BN + ReLU6): ONE matmul over the whole slab --
        # For expand_ratio==1 the wrapper passes an identity weight padded to
        # hidden_p columns, so the hidden activation is lane-dense either way.
        def expand(slab):                                 # (k, W, Cin)
            k = slab.shape[0]
            v = slab.reshape(k * W, Cin).astype(we_ref.dtype)
            y = jnp.dot(v, we_ref[...], preferred_element_type=jnp.float32)
            if has_expand:
                y = jnp.clip(y + b1_ref[...], 0.0, 6.0)
            return y.reshape(k, W, hidden_p)

        xm = x_ref[0, pl.ds(row0, n_main), :, :]          # main rows
        top = x_ref[0, pl.ds(jnp.maximum(row0 - 1, 0), 1), :, :]
        if stride == 1:
            bot = x_ref[0, pl.ds(jnp.minimum(row0 + n_main, H - 1), 1), :, :]
            slab = jnp.concatenate([top, xm, bot], axis=0)    # (th_o+2, W, Cin)
        else:
            slab = jnp.concatenate([top, xm], axis=0)         # (2*th_o+1, W, Cin)

        # One large store of the expanded slab; only the 1-wide halo border is
        # written separately (no full-scratch zero fill).
        epad_ref[0:n_prows, 1:1 + W, :] = expand(slab).astype(scratch_dtype)
        zcol = jnp.zeros((n_prows, 1, hidden_p), scratch_dtype)
        epad_ref[0:n_prows, 0:1, :] = zcol                    # left zero pad
        epad_ref[0:n_prows, W + 1:W + 2, :] = zcol            # right zero pad

        @pl.when(r == 0)                                      # top image border
        def _():
            epad_ref[0:1, :, :] = jnp.zeros((1, W + 2, hidden_p), scratch_dtype)

        if stride == 1:
            @pl.when(r == num_r - 1)                          # bottom border
            def _():
                epad_ref[n_prows - 1:n_prows, :, :] = jnp.zeros(
                    (1, W + 2, hidden_p), scratch_dtype)
        # (stride 2 with even H never reads past the last main input row.)

        # ---- depthwise 3x3 + BN + ReLU6: per-output-row accumulation -------
        wd = wd_ref[...]                                      # (9, hidden_p)
        b2 = b2_ref[...]                                      # (1, hidden_p)
        for j in range(th_o):                                 # static unroll
            row_acc = jnp.zeros((Wo, hidden_p), jnp.float32)
            for ky in range(3):
                ep_row = epad_ref[stride * j + ky].astype(jnp.float32)
                for kx in range(3):
                    if stride == 1:
                        start = kx
                    else:
                        # padded col 2*jc+kx -> phase-major flat column
                        start = (kx % 2) * P + kx // 2
                    t = ky * 3 + kx
                    row_acc = row_acc + ep_row[start:start + Wo, :] * wd[t:t + 1, :]
            dw_ref[j] = jnp.clip(row_acc + b2, 0.0, 6.0).astype(scratch_dtype)

        # ---- project 1x1 conv + BN (+ residual): one matmul per block ------
        h = dw_ref[...].reshape(th_o * Wo, hidden_p)
        y = jnp.dot(h.astype(wp_ref.dtype), wp_ref[...],
                    preferred_element_type=jnp.float32) + b3_ref[...]
        if use_res:
            y = y + xm.reshape(th_o * W, Cin).astype(jnp.float32)
        o_ref[0] = y.reshape(th_o, Wo, oup).astype(o_ref.dtype)

    return kernel


# --------------------------- pallas_call wrapper ---------------------------- #

def _fused_inverted_residual_nhwc(x_nhwc, params, *, stride, expand_ratio,
                                  compute_dtype=jnp.float32,
                                  scratch_dtype=jnp.float32,
                                  row_tile=None, max_row_tile=16):
    N, H, W, Cin = x_nhwc.shape
    assert stride in (1, 2)
    has_expand = expand_ratio != 1
    hidden = params["w_dw"].shape[1]
    oup = params["w_project"].shape[1]
    use_res = (stride == 1) and (Cin == oup)
    if stride == 2:
        assert H % 2 == 0 and W % 2 == 0, "stride-2 path assumes even H, W"
    Ho, Wo = H // stride, W // stride

    # Lane-dense expanded channel count (padded channels stay exactly zero).
    hidden_p = _round_up(hidden, 128)
    pad_h = hidden_p - hidden

    # Fold inference-mode BN scales into the conv weights (tiny wrapper-side op).
    s2, b2 = _fold_bn(*params["bn2"])
    w_dw = params["w_dw"] * s2                            # (9, hidden)
    s3, b3 = _fold_bn(*params["bn3"])
    w_pr = params["w_project"] * s3                       # (hidden, oup)
    if has_expand:
        s1, b1 = _fold_bn(*params["bn1"])
        w_ex = params["w_expand"] * s1                    # (Cin, hidden)
    else:
        # Identity "expand": routes the input through the same MXU path so the
        # hidden activation is channel-padded/lane-dense without a wrapper pad.
        w_ex = jnp.eye(Cin, hidden, dtype=jnp.float32)
        b1 = None
    if pad_h:
        w_dw = jnp.pad(w_dw, ((0, 0), (0, pad_h)))
        b2 = jnp.pad(b2, ((0, 0), (0, pad_h)))
        w_pr = jnp.pad(w_pr, ((0, pad_h), (0, 0)))
        w_ex = jnp.pad(w_ex, ((0, 0), (0, pad_h)))
        if has_expand:
            b1 = jnp.pad(b1, ((0, 0), (0, pad_h)))
    w_ex = w_ex.astype(compute_dtype)
    w_pr = w_pr.astype(compute_dtype)

    def _const_spec(shape):
        zeros = (0,) * len(shape)
        return pl.BlockSpec(shape, lambda n, r, _z=zeros: _z)

    if stride == 2:
        # Odd input columns first, then even: the expanded slab then lands
        # contiguously in the phase-major padded-column layout of the kernel.
        # TODO(synk): do this phase split in-kernel with a strided pl.ds load
        # to drop this wrapper-side HBM pass.
        x_k = jnp.concatenate([x_nhwc[:, :, 1::2, :], x_nhwc[:, :, 0::2, :]],
                              axis=2)
    else:
        x_k = x_nhwc

    inputs = [x_k, w_ex]
    in_specs = [pl.BlockSpec((1, H, W, Cin), lambda n, r: (n, 0, 0, 0)),
                _const_spec((Cin, hidden_p))]
    if has_expand:
        inputs.append(b1)
        in_specs.append(_const_spec((1, hidden_p)))
    inputs += [w_dw, b2, w_pr, b3]
    in_specs += [_const_spec((9, hidden_p)), _const_spec((1, hidden_p)),
                 _const_spec((hidden_p, oup)), _const_spec((1, oup))]

    need_fn = functools.partial(
        _vmem_bytes, stride=stride, H=H, W=W, Cin=Cin, Wo=Wo, oup=oup,
        hidden_p=hidden_p, has_expand=has_expand,
        x_itemsize=x_nhwc.dtype.itemsize,
        out_itemsize=x_nhwc.dtype.itemsize,
        w_itemsize=jnp.dtype(compute_dtype).itemsize,
        scratch_itemsize=jnp.dtype(scratch_dtype).itemsize)

    cap = _vmem_capacity_bytes()
    if row_tile is None:
        th_o = _pick_row_tile(Ho, need_fn, budget_bytes=cap // 2,
                              max_tile=max_row_tile)
    else:
        th_o = row_tile
    assert Ho % th_o == 0, "row tile must divide the output height"
    R = Ho // th_o
    need = need_fn(th_o)
    vmem_limit = int(min(cap * 3 // 4, max(need * 3 // 2, 32 << 20)))

    n_prows = th_o + 2 if stride == 1 else 2 * th_o + 1
    scratch = [pltpu.VMEM((n_prows, W + 2, hidden_p), scratch_dtype),
               pltpu.VMEM((th_o, Wo, hidden_p), scratch_dtype)]

    kernel = _make_fused_kernel(stride=stride, has_expand=has_expand,
                                use_res=use_res, H=H, W=W, Cin=Cin,
                                hidden_p=hidden_p, oup=oup, th_o=th_o,
                                scratch_dtype=scratch_dtype)

    return pl.pallas_call(
        kernel,
        out_shape=jax.ShapeDtypeStruct((N, Ho, Wo, oup), x_nhwc.dtype),
        grid=(N, R),
        in_specs=in_specs,
        out_specs=pl.BlockSpec((1, th_o, Wo, oup), lambda n, r: (n, r, 0, 0)),
        scratch_shapes=scratch,
        compiler_params=pltpu.CompilerParams(
            dimension_semantics=("parallel", "parallel"),
            vmem_limit_bytes=vmem_limit),
    )(*inputs)


def inverted_residual_forward(x_nchw, params, *, stride, expand_ratio,
                              compute_dtype=jnp.float32,
                              scratch_dtype=jnp.float32, row_tile=None):
    """Forward matching InvertedResidual(inp, oup, stride, expand_ratio) (NCHW)."""
    x = jnp.transpose(x_nchw, (0, 2, 3, 1))               # -> NHWC
    y = _fused_inverted_residual_nhwc(x, params, stride=stride,
                                      expand_ratio=expand_ratio,
                                      compute_dtype=compute_dtype,
                                      scratch_dtype=scratch_dtype,
                                      row_tile=row_tile)
    return jnp.transpose(y, (0, 3, 1, 2))                 # -> NCHW


# ------------------------------ params / ref -------------------------------- #

def init_params(key, inp, oup, expand_ratio):
    hidden = int(round(inp * expand_ratio))
    ks = jax.random.split(key, 16)

    def bn(i, c):
        return (1.0 + 0.1 * jax.random.normal(ks[i], (c,), jnp.float32),
                0.1 * jax.random.normal(ks[i + 1], (c,), jnp.float32),
                0.1 * jax.random.normal(ks[i + 2], (c,), jnp.float32),
                0.5 + jnp.abs(jax.random.normal(ks[i + 3], (c,), jnp.float32)))

    p = {}
    if expand_ratio != 1:
        p["w_expand"] = 0.1 * jax.random.normal(ks[0], (inp, hidden), jnp.float32)
        p["bn1"] = bn(1, hidden)
    p["w_dw"] = 0.1 * jax.random.normal(ks[5], (9, hidden), jnp.float32)
    p["bn2"] = bn(6, hidden)
    p["w_project"] = 0.1 * jax.random.normal(ks[10], (hidden, oup), jnp.float32)
    p["bn3"] = bn(11, oup)
    return p


def reference_forward(x_nchw, params, *, stride, expand_ratio):
    """Pure-JAX reference (inference-mode BN) for correctness checking."""
    inp = x_nchw.shape[1]
    x = jnp.transpose(x_nchw, (0, 2, 3, 1))
    h = x
    if expand_ratio != 1:
        s1, b1 = _fold_bn(*params["bn1"])
        h = jnp.einsum("nhwc,cd->nhwd", h, params["w_expand"]) * s1 + b1
        h = jnp.clip(h, 0.0, 6.0)
    hidden = h.shape[-1]
    rhs = params["w_dw"].reshape(3, 3, 1, hidden)
    s2, b2 = _fold_bn(*params["bn2"])
    h = lax.conv_general_dilated(
        h, rhs, window_strides=(stride, stride), padding=((1, 1), (1, 1)),
        dimension_numbers=("NHWC", "HWIO", "NHWC"), feature_group_count=hidden)
    h = jnp.clip(h * s2 + b2, 0.0, 6.0)
    s3, b3 = _fold_bn(*params["bn3"])
    y = jnp.einsum("nhwc,cd->nhwd", h, params["w_project"]) * s3 + b3
    oup = params["w_project"].shape[1]
    if stride == 1 and inp == oup:
        y = y + x
    return jnp.transpose(y, (0, 3, 1, 2))


# --------------------------------- main -------------------------------------- #

if __name__ == "__main__":
    configs = [
        # (stride 1, expand 6, residual) -- primary config, row-tiled (R=4)
        dict(inp=4, oup=4, stride=1, expand_ratio=6, batch=2, H=16, W=16,
             row_tile=4),
        # (stride 2, expand 6) -- direct stride-2 path, row-tiled (R=4)
        dict(inp=4, oup=8, stride=2, expand_ratio=6, batch=2, H=16, W=16,
             row_tile=2),
        # (stride 1, expand 1, residual) -- identity-expand path, auto tile
        dict(inp=8, oup=8, stride=1, expand_ratio=1, batch=2, H=16, W=16,
             row_tile=None),
    ]

    key = jax.random.PRNGKey(0)
    for cfg in configs:
        key, kx, kp = jax.random.split(key, 3)
        x = jax.random.normal(kx, (cfg["batch"], cfg["inp"], cfg["H"], cfg["W"]),
                              jnp.float32)
        params = init_params(kp, cfg["inp"], cfg["oup"], cfg["expand_ratio"])

        out = jax.block_until_ready(inverted_residual_forward(
            x, params, stride=cfg["stride"], expand_ratio=cfg["expand_ratio"],
            row_tile=cfg["row_tile"]))
        ref = jax.block_until_ready(reference_forward(
            x, params, stride=cfg["stride"], expand_ratio=cfg["expand_ratio"]))
        np.testing.assert_allclose(np.asarray(out), np.asarray(ref),
                                   rtol=1e-4, atol=1e-4)

    print("KERNEL_OK")
</pallas_src>

<mosaic_0001>
module attributes {stable_mosaic.version = 11 : i64} {
  func.func @kernel(%arg0: i32, %arg1: i32, %arg2: memref<1x16x16x4xf32, #tpu.memory_space<vmem>>, %arg3: memref<4x128xf32, #tpu.memory_space<vmem>>, %arg4: memref<1x128xf32, #tpu.memory_space<vmem>>, %arg5: memref<9x128xf32, #tpu.memory_space<vmem>>, %arg6: memref<1x128xf32, #tpu.memory_space<vmem>>, %arg7: memref<128x4xf32, #tpu.memory_space<vmem>>, %arg8: memref<1x4xf32, #tpu.memory_space<vmem>>, %arg9: memref<1x4x16x4xf32, #tpu.memory_space<vmem>>, %arg10: memref<6x18x128xf32, #tpu.memory_space<vmem>>, %arg11: memref<4x16x128xf32, #tpu.memory_space<vmem>>) attributes {dimension_semantics = [#tpu.dimension_semantics<parallel>, #tpu.dimension_semantics<parallel>], iteration_bounds = array<i64: 2, 4>, scalar_prefetch = 0 : i64, scratch_operands = 2 : i64, tpu.core_type = #tpu.core_type<tc>, window_params = [{transform_indices = @transform_0, window_bounds = array<i64: 1, 16, 16, 4>}, {pipeline_mode = #tpu.pipeline_mode<synchronous>, transform_indices = @transform_1, window_bounds = array<i64: 4, 128>}, {pipeline_mode = #tpu.pipeline_mode<synchronous>, transform_indices = @transform_2, window_bounds = array<i64: 1, 128>}, {pipeline_mode = #tpu.pipeline_mode<synchronous>, transform_indices = @transform_3, window_bounds = array<i64: 9, 128>}, {pipeline_mode = #tpu.pipeline_mode<synchronous>, transform_indices = @transform_4, window_bounds = array<i64: 1, 128>}, {pipeline_mode = #tpu.pipeline_mode<synchronous>, transform_indices = @transform_5, window_bounds = array<i64: 128, 4>}, {pipeline_mode = #tpu.pipeline_mode<synchronous>, transform_indices = @transform_6, window_bounds = array<i64: 1, 4>}, {transform_indices = @transform_7, window_bounds = array<i64: 1, 4, 16, 4>}]} {
    %c4_i32 = arith.constant 4 : i32
    %0 = arith.muli %arg1, %c4_i32 : i32
    %c1_i32 = arith.constant 1 : i32
    %1 = arith.muli %0, %c1_i32 : i32
    %2 = tpu.assume_multiple %1, 4 : i32
    %c0 = arith.constant 0 : index
    %3 = arith.index_cast %2 : i32 to index
    %c0_0 = arith.constant 0 : index
    %c0_1 = arith.constant 0 : index
    %4 = vector.load %arg2[%c0, %3, %c0_0, %c0_1] : memref<1x16x16x4xf32, #tpu.memory_space<vmem>>, vector<1x4x16x4xf32>
    %5 = vector.shape_cast %4 : vector<1x4x16x4xf32> to vector<4x16x4xf32>
    %c1_i32_2 = arith.constant 1 : i32
    %6 = arith.subi %2, %c1_i32_2 : i32
    %c0_i32 = arith.constant 0 : i32
    %7 = arith.maxsi %6, %c0_i32 : i32
    %c0_3 = arith.constant 0 : index
    %8 = arith.index_cast %7 : i32 to index
    %c0_4 = arith.constant 0 : index
    %c0_5 = arith.constant 0 : index
    %9 = vector.load %arg2[%c0_3, %8, %c0_4, %c0_5] : memref<1x16x16x4xf32, #tpu.memory_space<vmem>>, vector<1x1x16x4xf32>
    %10 = vector.shape_cast %9 : vector<1x1x16x4xf32> to vector<1x16x4xf32>
    %c4_i32_6 = arith.constant 4 : i32
    %11 = arith.addi %2, %c4_i32_6 : i32
    %c15_i32 = arith.constant 15 : i32
    %12 = arith.minsi %11, %c15_i32 : i32
    %c0_7 = arith.constant 0 : index
    %13 = arith.index_cast %12 : i32 to index
    %c0_8 = arith.constant 0 : index
    %c0_9 = arith.constant 0 : index
    %14 = vector.load %arg2[%c0_7, %13, %c0_8, %c0_9] : memref<1x16x16x4xf32, #tpu.memory_space<vmem>>, vector<1x1x16x4xf32>
    %15 = vector.shape_cast %14 : vector<1x1x16x4xf32> to vector<1x16x4xf32>
    %16 = tpu.concatenate %10, %5, %15 in 0 : vector<1x16x4xf32>, vector<4x16x4xf32>, vector<1x16x4xf32> -> vector<6x16x4xf32>
    %17 = vector.shape_cast %16 : vector<6x16x4xf32> to vector<96x4xf32>
    %c0_10 = arith.constant 0 : index
    %c0_11 = arith.constant 0 : index
    %18 = vector.load %arg3[%c0_10, %c0_11] : memref<4x128xf32, #tpu.memory_space<vmem>>, vector<4x128xf32>
    %cst = arith.constant dense<0.000000e+00> : vector<96x128xf32>
    %19 = tpu.matmul %17, %18, %cst {dimension_numbers = #tpu.dot_dimension_numbers<[1], [0], [0], [1], [0, 0, 1, 1], [], []>} : vector<96x4xf32>, vector<4x128xf32>, vector<96x128xf32> -> vector<96x128xf32>
    %c0_12 = arith.constant 0 : index
    %c0_13 = arith.constant 0 : index
    %20 = vector.load %arg4[%c0_12, %c0_13] : memref<1x128xf32, #tpu.memory_space<vmem>>, vector<1x128xf32>
    %21 = vector.broadcast %20 : vector<1x128xf32> to vector<96x128xf32>
    %22 = arith.addf %19, %21 : vector<96x128xf32>
    %cst_14 = arith.constant 0.000000e+00 : f32
    %cst_15 = arith.constant 6.000000e+00 : f32
    %23 = vector.broadcast %cst_14 : f32 to vector<96x128xf32>
    %24 = arith.maximumf %23, %22 : vector<96x128xf32>
    %25 = vector.broadcast %cst_15 : f32 to vector<96x128xf32>
    %26 = arith.minimumf %25, %24 : vector<96x128xf32>
    %27 = vector.shape_cast %26 : vector<96x128xf32> to vector<6x16x128xf32>
    %c0_16 = arith.constant 0 : index
    %c1 = arith.constant 1 : index
    %c0_17 = arith.constant 0 : index
    %28 = vector.load %arg10[%c0_16, %c1, %c0_17] : memref<6x18x128xf32, #tpu.memory_space<vmem>>, vector<6x16x128xf32>
    tpu.vector_store %arg10[%c0_16, %c1, %c0_17], %27 {strides = array<i32>} : memref<6x18x128xf32, #tpu.memory_space<vmem>>, vector<6x16x128xf32>,
    %cst_18 = arith.constant 0.000000e+00 : f32
    %29 = vector.broadcast %cst_18 : f32 to vector<6x1x128xf32>
    %c0_19 = arith.constant 0 : index
    %c0_20 = arith.constant 0 : index
    %c0_21 = arith.constant 0 : index
    %30 = vector.load %arg10[%c0_19, %c0_20, %c0_21] : memref<6x18x128xf32, #tpu.memory_space<vmem>>, vector<6x1x128xf32>
    tpu.vector_store %arg10[%c0_19, %c0_20, %c0_21], %29 {strides = array<i32>} : memref<6x18x128xf32, #tpu.memory_space<vmem>>, vector<6x1x128xf32>,
    %c0_22 = arith.constant 0 : index
    %c17 = arith.constant 17 : index
    %c0_23 = arith.constant 0 : index
    %31 = vector.load %arg10[%c0_22, %c17, %c0_23] : memref<6x18x128xf32, #tpu.memory_space<vmem>>, vector<6x1x128xf32>
    tpu.vector_store %arg10[%c0_22, %c17, %c0_23], %29 {strides = array<i32>} : memref<6x18x128xf32, #tpu.memory_space<vmem>>, vector<6x1x128xf32>,
    %c0_i32_24 = arith.constant 0 : i32
    %32 = arith.cmpi eq, %arg1, %c0_i32_24 : i32
    %33 = arith.extui %32 : i1 to i32
    %c0_i32_25 = arith.constant 0 : i32
    %34 = arith.cmpi ne, %33, %c0_i32_25 : i32
    scf.if %34 {
      %cst_99 = arith.constant 0.000000e+00 : f32
      %297 = vector.broadcast %cst_99 : f32 to vector<1x18x128xf32>
      %c0_100 = arith.constant 0 : index
      %c0_101 = arith.constant 0 : index
      %c0_102 = arith.constant 0 : index
      %298 = vector.load %arg10[%c0_100, %c0_101, %c0_102] : memref<6x18x128xf32, #tpu.memory_space<vmem>>, vector<1x18x128xf32>
      tpu.vector_store %arg10[%c0_100, %c0_101, %c0_102], %297 {strides = array<i32>} : memref<6x18x128xf32, #tpu.memory_space<vmem>>, vector<1x18x128xf32>,
    } else {
    }
    %c3_i32 = arith.constant 3 : i32
    %35 = arith.cmpi eq, %arg1, %c3_i32 : i32
    %36 = arith.extui %35 : i1 to i32
    %c0_i32_26 = arith.constant 0 : i32
    %37 = arith.cmpi ne, %36, %c0_i32_26 : i32
    scf.if %37 {
      %cst_99 = arith.constant 0.000000e+00 : f32
      %297 = vector.broadcast %cst_99 : f32 to vector<1x18x128xf32>
      %c5_100 = arith.constant 5 : index
      %c0_101 = arith.constant 0 : index
      %c0_102 = arith.constant 0 : index
      %298 = vector.load %arg10[%c5_100, %c0_101, %c0_102] : memref<6x18x128xf32, #tpu.memory_space<vmem>>, vector<1x18x128xf32>
      tpu.vector_store %arg10[%c5_100, %c0_101, %c0_102], %297 {strides = array<i32>} : memref<6x18x128xf32, #tpu.memory_space<vmem>>, vector<1x18x128xf32>,
    } else {
    }
    %c0_27 = arith.constant 0 : index
    %c0_28 = arith.constant 0 : index
    %38 = vector.load %arg5[%c0_27, %c0_28] : memref<9x128xf32, #tpu.memory_space<vmem>>, vector<9x128xf32>
    %c0_29 = arith.constant 0 : index
    %c0_30 = arith.constant 0 : index
    %39 = vector.load %arg6[%c0_29, %c0_30] : memref<1x128xf32, #tpu.memory_space<vmem>>, vector<1x128xf32>
    %cst_31 = arith.constant 0.000000e+00 : f32
    %40 = vector.broadcast %cst_31 : f32 to vector<16x128xf32>
    %c0_32 = arith.constant 0 : index
    %c0_33 = arith.constant 0 : index
    %c0_34 = arith.constant 0 : index
    %41 = vector.load %arg10[%c0_32, %c0_33, %c0_34] : memref<6x18x128xf32, #tpu.memory_space<vmem>>, vector<1x18x128xf32>
    %42 = vector.shape_cast %41 : vector<1x18x128xf32> to vector<18x128xf32>
    %43 = vector.extract_strided_slice %42 {offsets = [0, 0], sizes = [16, 128], strides = [1, 1]} : vector<18x128xf32> to vector<16x128xf32>
    %44 = vector.extract_strided_slice %38 {offsets = [0, 0], sizes = [1, 128], strides = [1, 1]} : vector<9x128xf32> to vector<1x128xf32>
    %45 = vector.broadcast %44 : vector<1x128xf32> to vector<16x128xf32>
    %46 = arith.mulf %43, %45 : vector<16x128xf32>
    %47 = arith.addf %40, %46 : vector<16x128xf32>
    %48 = vector.extract_strided_slice %42 {offsets = [1, 0], sizes = [16, 128], strides = [1, 1]} : vector<18x128xf32> to vector<16x128xf32>
    %49 = vector.extract_strided_slice %38 {offsets = [1, 0], sizes = [1, 128], strides = [1, 1]} : vector<9x128xf32> to vector<1x128xf32>
    %50 = vector.broadcast %49 : vector<1x128xf32> to vector<16x128xf32>
    %51 = arith.mulf %48, %50 : vector<16x128xf32>
    %52 = arith.addf %47, %51 : vector<16x128xf32>
    %53 = vector.extract_strided_slice %42 {offsets = [2, 0], sizes = [16, 128], strides = [1, 1]} : vector<18x128xf32> to vector<16x128xf32>
    %54 = vector.extract_strided_slice %38 {offsets = [2, 0], sizes = [1, 128], strides = [1, 1]} : vector<9x128xf32> to vector<1x128xf32>
    %55 = vector.broadcast %54 : vector<1x128xf32> to vector<16x128xf32>
    %56 = arith.mulf %53, %55 : vector<16x128xf32>
    %57 = arith.addf %52, %56 : vector<16x128xf32>
    %c1_35 = arith.constant 1 : index
    %c0_36 = arith.constant 0 : index
    %c0_37 = arith.constant 0 : index
    %58 = vector.load %arg10[%c1_35, %c0_36, %c0_37] : memref<6x18x128xf32, #tpu.memory_space<vmem>>, vector<1x18x128xf32>
    %59 = vector.shape_cast %58 : vector<1x18x128xf32> to vector<18x128xf32>
    %60 = vector.extract_strided_slice %59 {offsets = [0, 0], sizes = [16, 128], strides = [1, 1]} : vector<18x128xf32> to vector<16x128xf32>
    %61 = vector.extract_strided_slice %38 {offsets = [3, 0], sizes = [1, 128], strides = [1, 1]} : vector<9x128xf32> to vector<1x128xf32>
    %62 = vector.broadcast %61 : vector<1x128xf32> to vector<16x128xf32>
    %63 = arith.mulf %60, %62 : vector<16x128xf32>
    %64 = arith.addf %57, %63 : vector<16x128xf32>
    %65 = vector.extract_strided_slice %59 {offsets = [1, 0], sizes = [16, 128], strides = [1, 1]} : vector<18x128xf32> to vector<16x128xf32>
    %66 = vector.extract_strided_slice %38 {offsets = [4, 0], sizes = [1, 128], strides = [1, 1]} : vector<9x128xf32> to vector<1x128xf32>
    %67 = vector.broadcast %66 : vector<1x128xf32> to vector<16x128xf32>
    %68 = arith.mulf %65, %67 : vector<16x128xf32>
    %69 = arith.addf %64, %68 : vector<16x128xf32>
    %70 = vector.extract_strided_slice %59 {offsets = [2, 0], sizes = [16, 128], strides = [1, 1]} : vector<18x128xf32> to vector<16x128xf32>
    %71 = vector.extract_strided_slice %38 {offsets = [5, 0], sizes = [1, 128], strides = [1, 1]} : vector<9x128xf32> to vector<1x128xf32>
    %72 = vector.broadcast %71 : vector<1x128xf32> to vector<16x128xf32>
    %73 = arith.mulf %70, %72 : vector<16x128xf32>
    %74 = arith.addf %69, %73 : vector<16x128xf32>
    %c2 = arith.constant 2 : index
    %c0_38 = arith.constant 0 : index
    %c0_39 = arith.constant 0 : index
    %75 = vector.load %arg10[%c2, %c0_38, %c0_39] : memref<6x18x128xf32, #tpu.memory_space<vmem>>, vector<1x18x128xf32>
    %76 = vector.shape_cast %75 : vector<1x18x128xf32> to vector<18x128xf32>
    %77 = vector.extract_strided_slice %76 {offsets = [0, 0], sizes = [16, 128], strides = [1, 1]} : vector<18x128xf32> to vector<16x128xf32>
    %78 = vector.extract_strided_slice %38 {offsets = [6, 0], sizes = [1, 128], strides = [1, 1]} : vector<9x128xf32> to vector<1x128xf32>
    %79 = vector.broadcast %78 : vector<1x128xf32> to vector<16x128xf32>
    %80 = arith.mulf %77, %79 : vector<16x128xf32>
    %81 = arith.addf %74, %80 : vector<16x128xf32>
    %82 = vector.extract_strided_slice %76 {offsets = [1, 0], sizes = [16, 128], strides = [1, 1]} : vector<18x128xf32> to vector<16x128xf32>
    %83 = vector.extract_strided_slice %38 {offsets = [7, 0], sizes = [1, 128], strides = [1, 1]} : vector<9x128xf32> to vector<1x128xf32>
    %84 = vector.broadcast %83 : vector<1x128xf32> to vector<16x128xf32>
    %85 = arith.mulf %82, %84 : vector<16x128xf32>
    %86 = arith.addf %81, %85 : vector<16x128xf32>
    %87 = vector.extract_strided_slice %76 {offsets = [2, 0], sizes = [16, 128], strides = [1, 1]} : vector<18x128xf32> to vector<16x128xf32>
    %88 = vector.extract_strided_slice %38 {offsets = [8, 0], sizes = [1, 128], strides = [1, 1]} : vector<9x128xf32> to vector<1x128xf32>
    %89 = vector.broadcast %88 : vector<1x128xf32> to vector<16x128xf32>
    %90 = arith.mulf %87, %89 : vector<16x128xf32>
    %91 = arith.addf %86, %90 : vector<16x128xf32>
    %92 = vector.broadcast %39 : vector<1x128xf32> to vector<16x128xf32>
    %93 = arith.addf %91, %92 : vector<16x128xf32>
    %cst_40 = arith.constant 0.000000e+00 : f32
    %cst_41 = arith.constant 6.000000e+00 : f32
    %94 = vector.broadcast %cst_40 : f32 to vector<16x128xf32>
    %95 = arith.maximumf %94, %93 : vector<16x128xf32>
    %96 = vector.broadcast %cst_41 : f32 to vector<16x128xf32>
    %97 = arith.minimumf %96, %95 : vector<16x128xf32>
    %c0_42 = arith.constant 0 : index
    %c0_43 = arith.constant 0 : index
    %c0_44 = arith.constant 0 : index
    %98 = vector.load %arg11[%c0_42, %c0_43, %c0_44] : memref<4x16x128xf32, #tpu.memory_space<vmem>>, vector<1x16x128xf32>
    %99 = vector.shape_cast %98 : vector<1x16x128xf32> to vector<16x128xf32>
    %100 = vector.shape_cast %97 : vector<16x128xf32> to vector<1x16x128xf32>
    tpu.vector_store %arg11[%c0_42, %c0_43, %c0_44], %100 {strides = array<i32>} : memref<4x16x128xf32, #tpu.memory_space<vmem>>, vector<1x16x128xf32>,
    %cst_45 = arith.constant 0.000000e+00 : f32
    %101 = vector.broadcast %cst_45 : f32 to vector<16x128xf32>
    %c1_46 = arith.constant 1 : index
    %c0_47 = arith.constant 0 : index
    %c0_48 = arith.constant 0 : index
    %102 = vector.load %arg10[%c1_46, %c0_47, %c0_48] : memref<6x18x128xf32, #tpu.memory_space<vmem>>, vector<1x18x128xf32>
    %103 = vector.shape_cast %102 : vector<1x18x128xf32> to vector<18x128xf32>
    %104 = vector.extract_strided_slice %103 {offsets = [0, 0], sizes = [16, 128], strides = [1, 1]} : vector<18x128xf32> to vector<16x128xf32>
    %105 = vector.extract_strided_slice %38 {offsets = [0, 0], sizes = [1, 128], strides = [1, 1]} : vector<9x128xf32> to vector<1x128xf32>
    %106 = vector.broadcast %105 : vector<1x128xf32> to vector<16x128xf32>
    %107 = arith.mulf %104, %106 : vector<16x128xf32>
    %108 = arith.addf %101, %107 : vector<16x128xf32>
    %109 = vector.extract_strided_slice %103 {offsets = [1, 0], sizes = [16, 128], strides = [1, 1]} : vector<18x128xf32> to vector<16x128xf32>
    %110 = vector.extract_strided_slice %38 {offsets = [1, 0], sizes = [1, 128], strides = [1, 1]} : vector<9x128xf32> to vector<1x128xf32>
    %111 = vector.broadcast %110 : vector<1x128xf32> to vector<16x128xf32>
    %112 = arith.mulf %109, %111 : vector<16x128xf32>
    %113 = arith.addf %108, %112 : vector<16x128xf32>
    %114 = vector.extract_strided_slice %103 {offsets = [2, 0], sizes = [16, 128], strides = [1, 1]} : vector<18x128xf32> to vector<16x128xf32>
    %115 = vector.extract_strided_slice %38 {offsets = [2, 0], sizes = [1, 128], strides = [1, 1]} : vector<9x128xf32> to vector<1x128xf32>
    %116 = vector.broadcast %115 : vector<1x128xf32> to vector<16x128xf32>
    %117 = arith.mulf %114, %116 : vector<16x128xf32>
    %118 = arith.addf %113, %117 : vector<16x128xf32>
    %c2_49 = arith.constant 2 : index
    %c0_50 = arith.constant 0 : index
    %c0_51 = arith.constant 0 : index
    %119 = vector.load %arg10[%c2_49, %c0_50, %c0_51] : memref<6x18x128xf32, #tpu.memory_space<vmem>>, vector<1x18x128xf32>
    %120 = vector.shape_cast %119 : vector<1x18x128xf32> to vector<18x128xf32>
    %121 = vector.extract_strided_slice %120 {offsets = [0, 0], sizes = [16, 128], strides = [1, 1]} : vector<18x128xf32> to vector<16x128xf32>
    %122 = vector.extract_strided_slice %38 {offsets = [3, 0], sizes = [1, 128], strides = [1, 1]} : vector<9x128xf32> to vector<1x128xf32>
    %123 = vector.broadcast %122 : vector<1x128xf32> to vector<16x128xf32>
    %124 = arith.mulf %121, %123 : vector<16x128xf32>
    %125 = arith.addf %118, %124 : vector<16x128xf32>
    %126 = vector.extract_strided_slice %120 {offsets = [1, 0], sizes = [16, 128], strides = [1, 1]} : vector<18x128xf32> to vector<16x128xf32>
    %127 = vector.extract_strided_slice %38 {offsets = [4, 0], sizes = [1, 128], strides = [1, 1]} : vector<9x128xf32> to vector<1x128xf32>
    %128 = vector.broadcast %127 : vector<1x128xf32> to vector<16x128xf32>
    %129 = arith.mulf %126, %128 : vector<16x128xf32>
    %130 = arith.addf %125, %129 : vector<16x128xf32>
    %131 = vector.extract_strided_slice %120 {offsets = [2, 0], sizes = [16, 128], strides = [1, 1]} : vector<18x128xf32> to vector<16x128xf32>
    %132 = vector.extract_strided_slice %38 {offsets = [5, 0], sizes = [1, 128], strides = [1, 1]} : vector<9x128xf32> to vector<1x128xf32>
    %133 = vector.broadcast %132 : vector<1x128xf32> to vector<16x128xf32>
    %134 = arith.mulf %131, %133 : vector<16x128xf32>
    %135 = arith.addf %130, %134 : vector<16x128xf32>
    %c3 = arith.constant 3 : index
    %c0_52 = arith.constant 0 : index
    %c0_53 = arith.constant 0 : index
    %136 = vector.load %arg10[%c3, %c0_52, %c0_53] : memref<6x18x128xf32, #tpu.memory_space<vmem>>, vector<1x18x128xf32>
    %137 = vector.shape_cast %136 : vector<1x18x128xf32> to vector<18x128xf32>
    %138 = vector.extract_strided_slice %137 {offsets = [0, 0], sizes = [16, 128], strides = [1, 1]} : vector<18x128xf32> to vector<16x128xf32>
    %139 = vector.extract_strided_slice %38 {offsets = [6, 0], sizes = [1, 128], strides = [1, 1]} : vector<9x128xf32> to vector<1x128xf32>
    %140 = vector.broadcast %139 : vector<1x128xf32> to vector<16x128xf32>
    %141 = arith.mulf %138, %140 : vector<16x128xf32>
    %142 = arith.addf %135, %141 : vector<16x128xf32>
    %143 = vector.extract_strided_slice %137 {offsets = [1, 0], sizes = [16, 128], strides = [1, 1]} : vector<18x128xf32> to vector<16x128xf32>
    %144 = vector.extract_strided_slice %38 {offsets = [7, 0], sizes = [1, 128], strides = [1, 1]} : vector<9x128xf32> to vector<1x128xf32>
    %145 = vector.broadcast %144 : vector<1x128xf32> to vector<16x128xf32>
    %146 = arith.mulf %143, %145 : vector<16x128xf32>
    %147 = arith.addf %142, %146 : vector<16x128xf32>
    %148 = vector.extract_strided_slice %137 {offsets = [2, 0], sizes = [16, 128], strides = [1, 1]} : vector<18x128xf32> to vector<16x128xf32>
    %149 = vector.extract_strided_slice %38 {offsets = [8, 0], sizes = [1, 128], strides = [1, 1]} : vector<9x128xf32> to vector<1x128xf32>
    %150 = vector.broadcast %149 : vector<1x128xf32> to vector<16x128xf32>
    %151 = arith.mulf %148, %150 : vector<16x128xf32>
    %152 = arith.addf %147, %151 : vector<16x128xf32>
    %153 = vector.broadcast %39 : vector<1x128xf32> to vector<16x128xf32>
    %154 = arith.addf %152, %153 : vector<16x128xf32>
    %cst_54 = arith.constant 0.000000e+00 : f32
    %cst_55 = arith.constant 6.000000e+00 : f32
    %155 = vector.broadcast %cst_54 : f32 to vector<16x128xf32>
    %156 = arith.maximumf %155, %154 : vector<16x128xf32>
    %157 = vector.broadcast %cst_55 : f32 to vector<16x128xf32>
    %158 = arith.minimumf %157, %156 : vector<16x128xf32>
    %c1_56 = arith.constant 1 : index
    %c0_57 = arith.constant 0 : index
    %c0_58 = arith.constant 0 : index
    %159 = vector.load %arg11[%c1_56, %c0_57, %c0_58] : memref<4x16x128xf32, #tpu.memory_space<vmem>>, vector<1x16x128xf32>
    %160 = vector.shape_cast %159 : vector<1x16x128xf32> to vector<16x128xf32>
    %161 = vector.shape_cast %158 : vector<16x128xf32> to vector<1x16x128xf32>
    tpu.vector_store %arg11[%c1_56, %c0_57, %c0_58], %161 {strides = array<i32>} : memref<4x16x128xf32, #tpu.memory_space<vmem>>, vector<1x16x128xf32>,
    %cst_59 = arith.constant 0.000000e+00 : f32
    %162 = vector.broadcast %cst_59 : f32 to vector<16x128xf32>
    %c2_60 = arith.constant 2 : index
    %c0_61 = arith.constant 0 : index
    %c0_62 = arith.constant 0 : index
    %163 = vector.load %arg10[%c2_60, %c0_61, %c0_62] : memref<6x18x128xf32, #tpu.memory_space<vmem>>, vector<1x18x128xf32>
    %164 = vector.shape_cast %163 : vector<1x18x128xf32> to vector<18x128xf32>
    %165 = vector.extract_strided_slice %164 {offsets = [0, 0], sizes = [16, 128], strides = [1, 1]} : vector<18x128xf32> to vector<16x128xf32>
    %166 = vector.extract_strided_slice %38 {offsets = [0, 0], sizes = [1, 128], strides = [1, 1]} : vector<9x128xf32> to vector<1x128xf32>
    %167 = vector.broadcast %166 : vector<1x128xf32> to vector<16x128xf32>
    %168 = arith.mulf %165, %167 : vector<16x128xf32>
    %169 = arith.addf %162, %168 : vector<16x128xf32>
    %170 = vector.extract_strided_slice %164 {offsets = [1, 0], sizes = [16, 128], strides = [1, 1]} : vector<18x128xf32> to vector<16x128xf32>
    %171 = vector.extract_strided_slice %38 {offsets = [1, 0], sizes = [1, 128], strides = [1, 1]} : vector<9x128xf32> to vector<1x128xf32>
    %172 = vector.broadcast %171 : vector<1x128xf32> to vector<16x128xf32>
    %173 = arith.mulf %170, %172 : vector<16x128xf32>
    %174 = arith.addf %169, %173 : vector<16x128xf32>
    %175 = vector.extract_strided_slice %164 {offsets = [2, 0], sizes = [16, 128], strides = [1, 1]} : vector<18x128xf32> to vector<16x128xf32>
    %176 = vector.extract_strided_slice %38 {offsets = [2, 0], sizes = [1, 128], strides = [1, 1]} : vector<9x128xf32> to vector<1x128xf32>
    %177 = vector.broadcast %176 : vector<1x128xf32> to vector<16x128xf32>
    %178 = arith.mulf %175, %177 : vector<16x128xf32>
    %179 = arith.addf %174, %178 : vector<16x128xf32>
    %c3_63 = arith.constant 3 : index
    %c0_64 = arith.constant 0 : index
    %c0_65 = arith.constant 0 : index
    %180 = vector.load %arg10[%c3_63, %c0_64, %c0_65] : memref<6x18x128xf32, #tpu.memory_space<vmem>>, vector<1x18x128xf32>
    %181 = vector.shape_cast %180 : vector<1x18x128xf32> to vector<18x128xf32>
    %182 = vector.extract_strided_slice %181 {offsets = [0, 0], sizes = [16, 128], strides = [1, 1]} : vector<18x128xf32> to vector<16x128xf32>
    %183 = vector.extract_strided_slice %38 {offsets = [3, 0], sizes = [1, 128], strides = [1, 1]} : vector<9x128xf32> to vector<1x128xf32>
    %184 = vector.broadcast %183 : vector<1x128xf32> to vector<16x128xf32>
    %185 = arith.mulf %182, %184 : vector<16x128xf32>
    %186 = arith.addf %179, %185 : vector<16x128xf32>
    %187 = vector.extract_strided_slice %181 {offsets = [1, 0], sizes = [16, 128], strides = [1, 1]} : vector<18x128xf32> to vector<16x128xf32>
    %188 = vector.extract_strided_slice %38 {offsets = [4, 0], sizes = [1, 128], strides = [1, 1]} : vector<9x128xf32> to vector<1x128xf32>
    %189 = vector.broadcast %188 : vector<1x128xf32> to vector<16x128xf32>
    %190 = arith.mulf %187, %189 : vector<16x128xf32>
    %191 = arith.addf %186, %190 : vector<16x128xf32>
    %192 = vector.extract_strided_slice %181 {offsets = [2, 0], sizes = [16, 128], strides = [1, 1]} : vector<18x128xf32> to vector<16x128xf32>
    %193 = vector.extract_strided_slice %38 {offsets = [5, 0], sizes = [1, 128], strides = [1, 1]} : vector<9x128xf32> to vector<1x128xf32>
    %194 = vector.broadcast %193 : vector<1x128xf32> to vector<16x128xf32>
    %195 = arith.mulf %192, %194 : vector<16x128xf32>
    %196 = arith.addf %191, %195 : vector<16x128xf32>
    %c4 = arith.constant 4 : index
    %c0_66 = arith.constant 0 : index
    %c0_67 = arith.constant 0 : index
    %197 = vector.load %arg10[%c4, %c0_66, %c0_67] : memref<6x18x128xf32, #tpu.memory_space<vmem>>, vector<1x18x128xf32>
    %198 = vector.shape_cast %197 : vector<1x18x128xf32> to vector<18x128xf32>
    %199 = vector.extract_strided_slice %198 {offsets = [0, 0], sizes = [16, 128], strides = [1, 1]} : vector<18x128xf32> to vector<16x128xf32>
    %200 = vector.extract_strided_slice %38 {offsets = [6, 0], sizes = [1, 128], strides = [1, 1]} : vector<9x128xf32> to vector<1x128xf32>
    %201 = vector.broadcast %200 : vector<1x128xf32> to vector<16x128xf32>
    %202 = arith.mulf %199, %201 : vector<16x128xf32>
    %203 = arith.addf %196, %202 : vector<16x128xf32>
    %204 = vector.extract_strided_slice %198 {offsets = [1, 0], sizes = [16, 128], strides = [1, 1]} : vector<18x128xf32> to vector<16x128xf32>
    %205 = vector.extract_strided_slice %38 {offsets = [7, 0], sizes = [1, 128], strides = [1, 1]} : vector<9x128xf32> to vector<1x128xf32>
    %206 = vector.broadcast %205 : vector<1x128xf32> to vector<16x128xf32>
    %207 = arith.mulf %204, %206 : vector<16x128xf32>
    %208 = arith.addf %203, %207 : vector<16x128xf32>
    %209 = vector.extract_strided_slice %198 {offsets = [2, 0], sizes = [16, 128], strides = [1, 1]} : vector<18x128xf32> to vector<16x128xf32>
    %210 = vector.extract_strided_slice %38 {offsets = [8, 0], sizes = [1, 128], strides = [1, 1]} : vector<9x128xf32> to vector<1x128xf32>
    %211 = vector.broadcast %210 : vector<1x128xf32> to vector<16x128xf32>
    %212 = arith.mulf %209, %211 : vector<16x128xf32>
    %213 = arith.addf %208, %212 : vector<16x128xf32>
    %214 = vector.broadcast %39 : vector<1x128xf32> to vector<16x128xf32>
    %215 = arith.addf %213, %214 : vector<16x128xf32>
    %cst_68 = arith.constant 0.000000e+00 : f32
    %cst_69 = arith.constant 6.000000e+00 : f32
    %216 = vector.broadcast %cst_68 : f32 to vector<16x128xf32>
    %217 = arith.maximumf %216, %215 : vector<16x128xf32>
    %218 = vector.broadcast %cst_69 : f32 to vector<16x128xf32>
    %219 = arith.minimumf %218, %217 : vector<16x128xf32>
    %c2_70 = arith.constant 2 : index
    %c0_71 = arith.constant 0 : index
    %c0_72 = arith.constant 0 : index
    %220 = vector.load %arg11[%c2_70, %c0_71, %c0_72] : memref<4x16x128xf32, #tpu.memory_space<vmem>>, vector<1x16x128xf32>
    %221 = vector.shape_cast %220 : vector<1x16x128xf32> to vector<16x128xf32>
    %222 = vector.shape_cast %219 : vector<16x128xf32> to vector<1x16x128xf32>
    tpu.vector_store %arg11[%c2_70, %c0_71, %c0_72], %222 {strides = array<i32>} : memref<4x16x128xf32, #tpu.memory_space<vmem>>, vector<1x16x128xf32>,
    %cst_73 = arith.constant 0.000000e+00 : f32
    %223 = vector.broadcast %cst_73 : f32 to vector<16x128xf32>
    %c3_74 = arith.constant 3 : index
    %c0_75 = arith.constant 0 : index
    %c0_76 = arith.constant 0 : index
    %224 = vector.load %arg10[%c3_74, %c0_75, %c0_76] : memref<6x18x128xf32, #tpu.memory_space<vmem>>, vector<1x18x128xf32>
    %225 = vector.shape_cast %224 : vector<1x18x128xf32> to vector<18x128xf32>
    %226 = vector.extract_strided_slice %225 {offsets = [0, 0], sizes = [16, 128], strides = [1, 1]} : vector<18x128xf32> to vector<16x128xf32>
    %227 = vector.extract_strided_slice %38 {offsets = [0, 0], sizes = [1, 128], strides = [1, 1]} : vector<9x128xf32> to vector<1x128xf32>
    %228 = vector.broadcast %227 : vector<1x128xf32> to vector<16x128xf32>
    %229 = arith.mulf %226, %228 : vector<16x128xf32>
    %230 = arith.addf %223, %229 : vector<16x128xf32>
    %231 = vector.extract_strided_slice %225 {offsets = [1, 0], sizes = [16, 128], strides = [1, 1]} : vector<18x128xf32> to vector<16x128xf32>
    %232 = vector.extract_strided_slice %38 {offsets = [1, 0], sizes = [1, 128], strides = [1, 1]} : vector<9x128xf32> to vector<1x128xf32>
    %233 = vector.broadcast %232 : vector<1x128xf32> to vector<16x128xf32>
    %234 = arith.mulf %231, %233 : vector<16x128xf32>
    %235 = arith.addf %230, %234 : vector<16x128xf32>
    %236 = vector.extract_strided_slice %225 {offsets = [2, 0], sizes = [16, 128], strides = [1, 1]} : vector<18x128xf32> to vector<16x128xf32>
    %237 = vector.extract_strided_slice %38 {offsets = [2, 0], sizes = [1, 128], strides = [1, 1]} : vector<9x128xf32> to vector<1x128xf32>
    %238 = vector.broadcast %237 : vector<1x128xf32> to vector<16x128xf32>
    %239 = arith.mulf %236, %238 : vector<16x128xf32>
    %240 = arith.addf %235, %239 : vector<16x128xf32>
    %c4_77 = arith.constant 4 : index
    %c0_78 = arith.constant 0 : index
    %c0_79 = arith.constant 0 : index
    %241 = vector.load %arg10[%c4_77, %c0_78, %c0_79] : memref<6x18x128xf32, #tpu.memory_space<vmem>>, vector<1x18x128xf32>
    %242 = vector.shape_cast %241 : vector<1x18x128xf32> to vector<18x128xf32>
    %243 = vector.extract_strided_slice %242 {offsets = [0, 0], sizes = [16, 128], strides = [1, 1]} : vector<18x128xf32> to vector<16x128xf32>
    %244 = vector.extract_strided_slice %38 {offsets = [3, 0], sizes = [1, 128], strides = [1, 1]} : vector<9x128xf32> to vector<1x128xf32>
    %245 = vector.broadcast %244 : vector<1x128xf32> to vector<16x128xf32>
    %246 = arith.mulf %243, %245 : vector<16x128xf32>
    %247 = arith.addf %240, %246 : vector<16x128xf32>
    %248 = vector.extract_strided_slice %242 {offsets = [1, 0], sizes = [16, 128], strides = [1, 1]} : vector<18x128xf32> to vector<16x128xf32>
    %249 = vector.extract_strided_slice %38 {offsets = [4, 0], sizes = [1, 128], strides = [1, 1]} : vector<9x128xf32> to vector<1x128xf32>
    %250 = vector.broadcast %249 : vector<1x128xf32> to vector<16x128xf32>
    %251 = arith.mulf %248, %250 : vector<16x128xf32>
    %252 = arith.addf %247, %251 : vector<16x128xf32>
    %253 = vector.extract_strided_slice %242 {offsets = [2, 0], sizes = [16, 128], strides = [1, 1]} : vector<18x128xf32> to vector<16x128xf32>
    %254 = vector.extract_strided_slice %38 {offsets = [5, 0], sizes = [1, 128], strides = [1, 1]} : vector<9x128xf32> to vector<1x128xf32>
    %255 = vector.broadcast %254 : vector<1x128xf32> to vector<16x128xf32>
    %256 = arith.mulf %253, %255 : vector<16x128xf32>
    %257 = arith.addf %252, %256 : vector<16x128xf32>
    %c5 = arith.constant 5 : index
    %c0_80 = arith.constant 0 : index
    %c0_81 = arith.constant 0 : index
    %258 = vector.load %arg10[%c5, %c0_80, %c0_81] : memref<6x18x128xf32, #tpu.memory_space<vmem>>, vector<1x18x128xf32>
    %259 = vector.shape_cast %258 : vector<1x18x128xf32> to vector<18x128xf32>
    %260 = vector.extract_strided_slice %259 {offsets = [0, 0], sizes = [16, 128], strides = [1, 1]} : vector<18x128xf32> to vector<16x128xf32>
    %261 = vector.extract_strided_slice %38 {offsets = [6, 0], sizes = [1, 128], strides = [1, 1]} : vector<9x128xf32> to vector<1x128xf32>
    %262 = vector.broadcast %261 : vector<1x128xf32> to vector<16x128xf32>
    %263 = arith.mulf %260, %262 : vector<16x128xf32>
    %264 = arith.addf %257, %263 : vector<16x128xf32>
    %265 = vector.extract_strided_slice %259 {offsets = [1, 0], sizes = [16, 128], strides = [1, 1]} : vector<18x128xf32> to vector<16x128xf32>
    %266 = vector.extract_strided_slice %38 {offsets = [7, 0], sizes = [1, 128], strides = [1, 1]} : vector<9x128xf32> to vector<1x128xf32>
    %267 = vector.broadcast %266 : vector<1x128xf32> to vector<16x128xf32>
    %268 = arith.mulf %265, %267 : vector<16x128xf32>
    %269 = arith.addf %264, %268 : vector<16x128xf32>
    %270 = vector.extract_strided_slice %259 {offsets = [2, 0], sizes = [16, 128], strides = [1, 1]} : vector<18x128xf32> to vector<16x128xf32>
    %271 = vector.extract_strided_slice %38 {offsets = [8, 0], sizes = [1, 128], strides = [1, 1]} : vector<9x128xf32> to vector<1x128xf32>
    %272 = vector.broadcast %271 : vector<1x128xf32> to vector<16x128xf32>
    %273 = arith.mulf %270, %272 : vector<16x128xf32>
    %274 = arith.addf %269, %273 : vector<16x128xf32>
    %275 = vector.broadcast %39 : vector<1x128xf32> to vector<16x128xf32>
    %276 = arith.addf %274, %275 : vector<16x128xf32>
    %cst_82 = arith.constant 0.000000e+00 : f32
    %cst_83 = arith.constant 6.000000e+00 : f32
    %277 = vector.broadcast %cst_82 : f32 to vector<16x128xf32>
    %278 = arith.maximumf %277, %276 : vector<16x128xf32>
    %279 = vector.broadcast %cst_83 : f32 to vector<16x128xf32>
    %280 = arith.minimumf %279, %278 : vector<16x128xf32>
    %c3_84 = arith.constant 3 : index
    %c0_85 = arith.constant 0 : index
    %c0_86 = arith.constant 0 : index
    %281 = vector.load %arg11[%c3_84, %c0_85, %c0_86] : memref<4x16x128xf32, #tpu.memory_space<vmem>>, vector<1x16x128xf32>
    %282 = vector.shape_cast %281 : vector<1x16x128xf32> to vector<16x128xf32>
    %283 = vector.shape_cast %280 : vector<16x128xf32> to vector<1x16x128xf32>
    tpu.vector_store %arg11[%c3_84, %c0_85, %c0_86], %283 {strides = array<i32>} : memref<4x16x128xf32, #tpu.memory_space<vmem>>, vector<1x16x128xf32>,
    %c0_87 = arith.constant 0 : index
    %c0_88 = arith.constant 0 : index
    %c0_89 = arith.constant 0 : index
    %284 = vector.load %arg11[%c0_87, %c0_88, %c0_89] : memref<4x16x128xf32, #tpu.memory_space<vmem>>, vector<4x16x128xf32>
    %285 = vector.shape_cast %284 : vector<4x16x128xf32> to vector<64x128xf32>
    %c0_90 = arith.constant 0 : index
    %c0_91 = arith.constant 0 : index
    %286 = vector.load %arg7[%c0_90, %c0_91] : memref<128x4xf32, #tpu.memory_space<vmem>>, vector<128x4xf32>
    %cst_92 = arith.constant dense<0.000000e+00> : vector<64x4xf32>
    %287 = tpu.matmul %285, %286, %cst_92 {dimension_numbers = #tpu.dot_dimension_numbers<[1], [0], [0], [1], [0, 0, 1, 1], [], []>} : vector<64x128xf32>, vector<128x4xf32>, vector<64x4xf32> -> vector<64x4xf32>
    %c0_93 = arith.constant 0 : index
    %c0_94 = arith.constant 0 : index
    %288 = vector.load %arg8[%c0_93, %c0_94] : memref<1x4xf32, #tpu.memory_space<vmem>>, vector<1x4xf32>
    %289 = vector.broadcast %288 : vector<1x4xf32> to vector<64x4xf32>
    %290 = arith.addf %287, %289 : vector<64x4xf32>
    %291 = vector.shape_cast %5 : vector<4x16x4xf32> to vector<64x4xf32>
    %292 = arith.addf %290, %291 : vector<64x4xf32>
    %293 = vector.shape_cast %292 : vector<64x4xf32> to vector<4x16x4xf32>
    %c0_95 = arith.constant 0 : index
    %c0_96 = arith.constant 0 : index
    %c0_97 = arith.constant 0 : index
    %c0_98 = arith.constant 0 : index
    %294 = vector.load %arg9[%c0_95, %c0_96, %c0_97, %c0_98] : memref<1x4x16x4xf32, #tpu.memory_space<vmem>>, vector<1x4x16x4xf32>
    %295 = vector.shape_cast %294 : vector<1x4x16x4xf32> to vector<4x16x4xf32>
    %296 = vector.shape_cast %293 : vector<4x16x4xf32> to vector<1x4x16x4xf32>
    tpu.vector_store %arg9[%c0_95, %c0_96, %c0_97, %c0_98], %296 {strides = array<i32>} : memref<1x4x16x4xf32, #tpu.memory_space<vmem>>, vector<1x4x16x4xf32>,
    return
  }
  func.func @transform_0(%arg0: i32, %arg1: i32) -> (i32, i32, i32, i32) {
    %c0_i32 = arith.constant 0 : i32
    %c0_i32_0 = arith.constant 0 : i32
    %c0_i32_1 = arith.constant 0 : i32
    %c0_i32_2 = arith.constant 0 : i32
    return %arg0, %c0_i32, %c0_i32_0, %c0_i32_1 : i32, i32, i32, i32
  }
  func.func @transform_1(%arg0: i32, %arg1: i32) -> (i32, i32) {
    %c0_i32 = arith.constant 0 : i32
    %c0_i32_0 = arith.constant 0 : i32
    %c0_i32_1 = arith.constant 0 : i32
    return %c0_i32, %c0_i32_0 : i32, i32
  }
  func.func @transform_2(%arg0: i32, %arg1: i32) -> (i32, i32) {
    %c0_i32 = arith.constant 0 : i32
    %c0_i32_0 = arith.constant 0 : i32
    %c0_i32_1 = arith.constant 0 : i32
    return %c0_i32, %c0_i32_0 : i32, i32
  }
  func.func @transform_3(%arg0: i32, %arg1: i32) -> (i32, i32) {
    %c0_i32 = arith.constant 0 : i32
    %c0_i32_0 = arith.constant 0 : i32
    %c0_i32_1 = arith.constant 0 : i32
    return %c0_i32, %c0_i32_0 : i32, i32
  }
  func.func @transform_4(%arg0: i32, %arg1: i32) -> (i32, i32) {
    %c0_i32 = arith.constant 0 : i32
    %c0_i32_0 = arith.constant 0 : i32
    %c0_i32_1 = arith.constant 0 : i32
    return %c0_i32, %c0_i32_0 : i32, i32
  }
  func.func @transform_5(%arg0: i32, %arg1: i32) -> (i32, i32) {
    %c0_i32 = arith.constant 0 : i32
    %c0_i32_0 = arith.constant 0 : i32
    %c0_i32_1 = arith.constant 0 : i32
    return %c0_i32, %c0_i32_0 : i32, i32
  }
  func.func @transform_6(%arg0: i32, %arg1: i32) -> (i32, i32) {
    %c0_i32 = arith.constant 0 : i32
    %c0_i32_0 = arith.constant 0 : i32
    %c0_i32_1 = arith.constant 0 : i32
    return %c0_i32, %c0_i32_0 : i32, i32
  }
  func.func @transform_7(%arg0: i32, %arg1: i32) -> (i32, i32, i32, i32) {
    %c0_i32 = arith.constant 0 : i32
    %c0_i32_0 = arith.constant 0 : i32
    %c0_i32_1 = arith.constant 0 : i32
    return %arg0, %arg1, %c0_i32, %c0_i32_0 : i32, i32, i32, i32
  }
}

</mosaic_0001>

<bundles_post_ra>
// kernel: tpu_custom_call.1
= control target key start
LH: loop header
LB: loop body
LE: loop exit
PB: predicated region body
PF: predicated region fallthrough
CT: control target
= control target key end

     0   :  { %s1659_s24 = smov 0   ;;  %s1661_s25 = smov 0   ;;  %s2176_s0 = inlined_call_operand.vmem [shape: f32[2,16,16,4], index: 0, kind: input, shape index: {}]   ;;  %s2177_s1 = inlined_call_operand.vmem [shape: f32[4,128], index: 1, kind: input, shape index: {}]   ;;  %s2178_s2 = inlined_call_operand.vmem [shape: f32[1,128], index: 2, kind: input, shape index: {}]   ;;  %s2179_s3 = inlined_call_operand.vmem [shape: f32[9,128], index: 3, kind: input, shape index: {}]   ;;  %s2180_s4 = inlined_call_operand.vmem [shape: f32[1,128], index: 4, kind: input, shape index: {}]   ;;  %s2181_s5 = inlined_call_operand.vmem [shape: f32[128,4], index: 5, kind: input, shape index: {}]   ;;  %s2182_s6 = inlined_call_operand.vmem [shape: f32[1,4], index: 6, kind: input, shape index: {}]   ;;  %s2183_s7 = inlined_call_operand.vmem [shape: f32[2,16,16,4], index: 7, kind: output, shape index: {}]  }
   0x1   :  { %2184 = sst [smem:[#allocation5_spill]] %s2177_s1  ;;  %s1663_s26 = smov 0  }
   0x2   :  { %s1665_s27 = smov 0   ;;  %s1667_s28 = smov 0  }
   0x3 LB: > { %s26_s29 = sadd.s32 1, %s1606_s26  ;;  %s29_s30 = sadd.s32 1, %s1610_s27  ;;  %s1614_s28 = sphi %s1667_s28, %s17_s28   ;;  %s1610_s27 = sphi %s1665_s27, %s2191_s27   ;;  %s1606_s26 = sphi %s1663_s26, %s2190_s26   ;;  %s1602_s25 = sphi %s1661_s25, %s2189_s25   ;;  %s1598_s24 = sphi %s1659_s24, %s2188_s24  }
   0x4   : > { %p27_p0 = scmp.ge.s32.totalorder %s26_s29, 4  ;;  %p1349_p1 = scmp.ge.s32.totalorder %s1614_s28, 1 }
   0x5   : > { %p251_p2 = scmp.lt.s32.totalorder %s1614_s28, 9 }
   0x6   : > { %s2193_s29 = smov (%p27_p0, %s26_s29), 0  ;;  %s2195_s30 = smov (!%p27_p0, %s29_s30), %s1610_s27 }
   0x7   : > { %p252_p3 = pnand %p1349_p1, %p251_p2  ;;  %p31_p4 = scmp.ge.s32.totalorder %s2195_s30, 2 }
   0x8   : > { %s2186_s1 = sld [smem:[#allocation5_spill]] (!%p252_p3)  ;;  %vm374_vm0 = vcmask (!%p252_p3), 1043456   ;;  %p288_p5 = scmp.lt.s32.totalorder (!%p252_p3), %s1602_s25, 1  ;;  %vm337_vm1 = vcmask (!%p252_p3), 31744   ;;  %v1616_v13 = vmov (!%p252_p3), 0.0  }
   0x9   : > { %s2197_s30 = smov (%p31_p4, %s2195_s30), 0  ;;  %255 = sbr.rel (%p252_p3) target bundleno = 592 (0x250), region = 48 }
   0xa   : > { %2185 = sst [smem:[#allocation4_spill]] %s2197_s30  ;;  %s1695_s10 = sshll.u32 (!%p252_p3), %s1598_s24, 2  ;;  %539 = vst [vmem:[#allocation2] sm:$0x1] (!%p252_p3), %v1616_v13  ;;  %540 = vst [vmem:[#allocation2 + $0x18] sm:$0x1] (!%p252_p3), %v1616_v13 }
   0xb   : > { %p296_p6 = scmp.lt.s32.totalorder (!%p252_p3), %s1695_s10, 15  ;;  %s1383_s14 = sshll.u32 (!%p252_p3), %s1598_s24, 6  ;;  %541 = vst [vmem:[#allocation2 + $0x30] sm:$0x1] (!%p252_p3), %v1616_v13  ;;  %542 = vst [vmem:[#allocation2 + $0x48] sm:$0x1] (!%p252_p3), %v1616_v13 }
   0xc   : > { %s1358_s18 = sadd.s32 (!%p252_p3), 4294967295, %s1695_s10  ;;  %s322_s30 = sadd.s32 (!%p252_p3), 4, %s1695_s10  ;;  %543 = vst [vmem:[#allocation2 + $0x60] sm:$0x1] (!%p252_p3), %v1616_v13  ;;  %544 = vst [vmem:[#allocation2 + $0x78] sm:$0x1] (!%p252_p3), %v1616_v13 }
   0xd   : > { %p316_p7 = scmp.gt.s32.totalorder (!%p252_p3), %s1358_s18, 0  ;;  %p323_p8 = scmp.lt.s32.totalorder (!%p252_p3), %s322_s30, 15  ;;  %545 = vst [vmem:[#allocation2 + $0x11] sm:$0x1] (!%p252_p3), %v1616_v13  ;;  %546 = vst [vmem:[#allocation2 + $0x29] sm:$0x1] (!%p252_p3), %v1616_v13 }
   0xe   : > { %v329_v0 = vld [vmem:[%s2186_s1] sm:$0xf] (!%p252_p3)  ;;  %547 = vst [vmem:[#allocation2 + $0x41] sm:$0x1] (!%p252_p3), %v1616_v13  ;;  %548 = vst [vmem:[#allocation2 + $0x59] sm:$0x1] (!%p252_p3), %v1616_v13 }
   0xf   : > { %1421 = vmatprep.subr.msk.mxu0 (!%p252_p3), %vm374_vm0, %v329_v0  ;;  %549 = vst [vmem:[#allocation2 + $0x71] sm:$0x1] (!%p252_p3), %v1616_v13  ;;  %550 = vst [vmem:[#allocation2 + $0x89] sm:$0x1] (!%p252_p3), %v1616_v13  ;;  %v1361_v14 = vld [vmem:[%s2178_s2] ss:$0 sm:$0xff] (!%p252_p3) }
  0x10   : > { %1422 = vmatpush3.msk.msra.mxu0 %vm374_vm0, %v329_v0  ;;  %s2199_s25 = smov (!%p288_p5, %s1602_s25), 1  ;;  %s2201_s18 = smov (!%p316_p7, %s1358_s18), 0 }
  0x11   : > { %s297_s11 = scalar_select %p296_p6, %s1695_s10, 15 }
  0x12   : > { %s1354_s12 = sshll.u32 %s2199_s25, 5  ;;  %s1382_s15 = sshll.u32 %s2199_s25, 8 }
  0x13   : > { %s1353_s13 = sshll.u32 %s297_s11, 1  ;;  %s292_s8 = scalar_lea.vmem %s2176_s0, %s1382_s15 }
  0x14   : > { %s300_s16 = sadd.s32 %s1354_s12, %s1353_s13  ;;  %s306_s9 = scalar_lea.vmem %s292_s8, %s1383_s14 }
  0x15   : > { %s1355_s17 = sshll.u32 %s300_s16, 3  ;;  %s1359_s1 = sshll.u32 %s2201_s18, 4  ;;  %v1710_v3 = vld [vmem:[%s306_s9] sm:$0xff]  ;;  %v1716_v4 = vld [vmem:[%s306_s9 + $0x8] sm:$0xff]  ;;  %v1718_v5 = vld [vmem:[%s306_s9 + $0x10] sm:$0xff] }
  0x16   : > { %s1704_s21 = scalar_lea.vmem %s2183_s7, %s1355_s17  ;;  %s319_s11 = scalar_lea.vmem %s292_s8, %s1359_s1  ;;  %v1724_v6 = vld [vmem:[%s306_s9 + $0x18] sm:$0xff]  ;;  %v1726_v7 = vld [vmem:[%s306_s9 + $0x20] sm:$0xff]  ;;  %v1732_v8 = vld [vmem:[%s306_s9 + $0x28] sm:$0xff] }
  0x17   : > { %v320_v1 = vld [vmem:[%s319_s11] sm:$0xff]  ;;  %v321_v2 = vld [vmem:[%s319_s11 + $0x8] sm:$0xff]  ;;  %s2203_s30 = smov (!%p323_p8, %s322_s30), 15  ;;  %v1734_v9 = vld [vmem:[%s306_s9 + $0x30] sm:$0xff]  ;;  %p1375_p9 = scmp.ne.s32.totalorder %s1598_s24, 0 }
  0x18   : > { %1423 = vmatprep.mubr.msk.f32.mxu0 %vm337_vm1, %v320_v1  ;;  %s1360_s1 = sshll.u32 %s2203_s30, 4  ;;  %v1740_v10 = vld [vmem:[%s306_s9 + $0x38] sm:$0xff]  ;;  %v1617_v63 = vmov (!%p1375_p9), 0.0  }
  0x19   : > { %1424 = vmatmul.mubr.msk.f32.vlgmr.msra.gmra.mrb[0].mxu0 %vm337_vm1, %v321_v2  ;;  %s326_s25 = scalar_lea.vmem %s292_s8, %s1360_s1 }
  0x1a   : > { %1426 = vmatprep.mubr.msk.f32.mxu0 %vm337_vm1, %v1710_v3  ;;  %v327_v11 = vld [vmem:[%s326_s25] sm:$0xff]  ;;  %v328_v12 = vld [vmem:[%s326_s25 + $0x8] sm:$0xff] }
  0x1d   : > { %1427 = vmatmul.mubr.msk.f32.gmra.mrb[2].mxu0 %vm337_vm1, %v1716_v4 }
  0x1e   : > { %1429 = vmatprep.mubr.msk.f32.mxu0 %vm337_vm1, %v1718_v5 }
  0x21   : > { %1430 = vmatmul.mubr.msk.f32.gmra.mrb[4].mxu0 %vm337_vm1, %v1724_v6 }
  0x22   : > { %1432 = vmatprep.mubr.msk.f32.mxu0 %vm337_vm1, %v1726_v7 }
  0x25   : > { %1433 = vmatmul.mubr.msk.f32.gmra.mrb[6].mxu0 %vm337_vm1, %v1732_v8 }
  0x26   : > { %1435 = vmatprep.mubr.msk.f32.mxu0 %vm337_vm1, %v1734_v9 }
  0x29   : > { %1436 = vmatmul.mubr.msk.f32.gmra.mrb[8].mxu0 %vm337_vm1, %v1740_v10 }
  0x2a   : > { %1438 = vmatprep.mubr.msk.f32.mxu0 %vm337_vm1, %v327_v11 }
  0x2d   : > { %1439 = vmatmul.mubr.msk.f32.gmra.mrb[10].mxu0 %vm337_vm1, %v328_v12 }
  0xec   : > { %v1425_v15 = vpop.f32.mrb[0].mxu0 }
  0xed   : > { %v450_v16 = vadd.f32 %v1425_v15, %v1361_v14  ;;  %v444_v17 = vpop.f32.mrb[1].mxu0 }
  0xee   : > { %v445_v18 = vadd.f32 %v1361_v14, %v444_v17 }
  0xef   : > { %v504_v19 = vmax.f32 %v450_v16, 0.0 }
  0xf0   : > { %v503_v20 = vmax.f32 %v445_v18, 0.0  ;;  %v1428_v21 = vpop.f32.mrb[2].mxu0 }
  0xf1   : > { %v516_v22 = vmin.f32 %v504_v19, 6.0  ;;  %v460_v23 = vadd.f32 %v1428_v21, %v1361_v14  ;;  %v454_v24 = vpop.f32.mrb[3].mxu0 }
  0xf2   : > { %v515_v25 = vmin.f32 %v503_v20, 6.0  ;;  %v455_v26 = vadd.f32 %v1361_v14, %v454_v24 }
  0xf3   : > { %528 = vst [vmem:[#allocation2 + $0x9] sm:$0xff] %v516_v22  ;;  %v506_v27 = vmax.f32 %v460_v23, 0.0 }
  0xf4   : > { %527 = vst [vmem:[#allocation2 + $0x1] sm:$0xff] %v515_v25  ;;  %v505_v28 = vmax.f32 %v455_v26, 0.0  ;;  %v1431_v29 = vpop.f32.mrb[4].mxu0  ;;  %557 = vst [vmem:[#allocation2 + $0x10] sm:$0x3] (!%p1375_p9), %v1617_v63 }
  0xf5   : > { %v518_v30 = vmin.f32 %v506_v27, 6.0  ;;  %v470_v31 = vadd.f32 %v1431_v29, %v1361_v14  ;;  %v464_v32 = vpop.f32.mrb[5].mxu0  ;;  %555 = vst [vmem:[#allocation2] sm:$0xff] (!%p1375_p9), %v1617_v63  ;;  %556 = vst [vmem:[#allocation2 + $0x8] sm:$0xff] (!%p1375_p9), %v1617_v63 }
  0xf6   : > { %v517_v33 = vmin.f32 %v505_v28, 6.0  ;;  %v465_v34 = vadd.f32 %v1361_v14, %v464_v32 }
  0xf7   : > { %530 = vst [vmem:[#allocation2 + $0x21] sm:$0xff] %v518_v30  ;;  %v508_v35 = vmax.f32 %v470_v31, 0.0 }
  0xf8   : > { %529 = vst [vmem:[#allocation2 + $0x19] sm:$0xff] %v517_v33  ;;  %v507_v36 = vmax.f32 %v465_v34, 0.0  ;;  %v1434_v37 = vpop.f32.mrb[6].mxu0 }
  0xf9   : > { %v520_v38 = vmin.f32 %v508_v35, 6.0  ;;  %v480_v39 = vadd.f32 %v1434_v37, %v1361_v14  ;;  %v474_v40 = vpop.f32.mrb[7].mxu0 }
  0xfa   : > { %v519_v41 = vmin.f32 %v507_v36, 6.0  ;;  %v475_v42 = vadd.f32 %v1361_v14, %v474_v40 }
  0xfb   : > { %532 = vst [vmem:[#allocation2 + $0x39] sm:$0xff] %v520_v38  ;;  %v510_v43 = vmax.f32 %v480_v39, 0.0 }
  0xfc   : > { %531 = vst [vmem:[#allocation2 + $0x31] sm:$0xff] %v519_v41  ;;  %v509_v44 = vmax.f32 %v475_v42, 0.0  ;;  %v1437_v45 = vpop.f32.mrb[8].mxu0 }
  0xfd   : > { %v522_v46 = vmin.f32 %v510_v43, 6.0  ;;  %v490_v47 = vadd.f32 %v1437_v45, %v1361_v14  ;;  %v484_v48 = vpop.f32.mrb[9].mxu0 }
  0xfe   : > { %v521_v49 = vmin.f32 %v509_v44, 6.0  ;;  %v485_v50 = vadd.f32 %v1361_v14, %v484_v48 }
  0xff   : > { %534 = vst [vmem:[#allocation2 + $0x51] sm:$0xff] %v522_v46  ;;  %v512_v51 = vmax.f32 %v490_v47, 0.0 }
 0x100   : > { %533 = vst [vmem:[#allocation2 + $0x49] sm:$0xff] %v521_v49  ;;  %v511_v52 = vmax.f32 %v485_v50, 0.0  ;;  %v1440_v53 = vpop.f32.mrb[10].mxu0 }
 0x101   : > { %v524_v54 = vmin.f32 %v512_v51, 6.0  ;;  %v500_v55 = vadd.f32 %v1440_v53, %v1361_v14  ;;  %v494_v56 = vpop.f32.mrb[11].mxu0 }
 0x102   : > { %v523_v57 = vmin.f32 %v511_v52, 6.0  ;;  %v495_v58 = vadd.f32 %v1361_v14, %v494_v56  ;;  %554 = sbr.rel (%p1375_p9) target bundleno = 265 (0x109), region = 52 }
 0x103   : > { %536 = vst [vmem:[#allocation2 + $0x69] sm:$0xff] %v524_v54  ;;  %v514_v59 = vmax.f32 %v500_v55, 0.0 }
 0x104   : > { %535 = vst [vmem:[#allocation2 + $0x61] sm:$0xff] %v523_v57  ;;  %v513_v60 = vmax.f32 %v495_v58, 0.0 }
 0x105   : > { %v526_v61 = vmin.f32 %v514_v59, 6.0 }
 0x106   : > { %v525_v62 = vmin.f32 %v513_v60, 6.0 }
 0x107   : > { %538 = vst [vmem:[#allocation2 + $0x81] sm:$0xff] %v526_v61 }
 0x108   : > { %537 = vst [vmem:[#allocation2 + $0x79] sm:$0xff] %v525_v62 }
 0x109 PF: > { %p1376_p10 = scmp.ne.s32.totalorder %s1598_s24, 3 }
 0x10a   : > { %v1618_v0 = vmov (!%p1376_p10), 0.0  }
 0x10b   : > { %561 = sbr.rel (%p1376_p10) target bundleno = 274 (0x112), region = 56  ;;  %563 = vst [vmem:[#allocation2 + $0x78] sm:$0xff] (!%p1376_p10), %v1618_v0  ;;  %564 = vst [vmem:[#allocation2 + $0x80] sm:$0xff] (!%p1376_p10), %v1618_v0 }
 0x10c   : > { %565 = vst [vmem:[#allocation2 + $0x88] sm:$0x3] (!%p1376_p10), %v1618_v0 }
 0x112 PF: > { %v1105_v1 = vld [vmem:[%s2181_s5] sm:$0xff]  ;;  %v1106_v2 = vld [vmem:[%s2181_s5 + $0x8] sm:$0xff]  ;;  %v1107_v11 = vld [vmem:[%s2181_s5 + $0x10] sm:$0xff]  ;;  %v572_v12 = vlaneseq  ;;  %vm590_vm2 = vcmask 1046528   ;;  %vm610_vm3 = vcmask 1045504  }
 0x113   : > { %v1485_v13 = vpack.c.bf16 %v1106_v2, %v1105_v1  ;;  %v1108_v14 = vld [vmem:[%s2181_s5 + $0x18] sm:$0xff]  ;;  %v1109_v15 = vld [vmem:[%s2181_s5 + $0x20] sm:$0xff]  ;;  %v1110_v16 = vld [vmem:[%s2181_s5 + $0x28] sm:$0xff] }
 0x114   : > { %v1489_v17 = vpack.c.bf16 %v1108_v14, %v1107_v11  ;;  %v1111_v18 = vld [vmem:[%s2181_s5 + $0x30] sm:$0xff]  ;;  %v1112_v19 = vld [vmem:[%s2181_s5 + $0x38] sm:$0xff]  ;;  %v1113_v20 = vld [vmem:[%s2181_s5 + $0x40] sm:$0xff]  ;;  %v573_v21 = vshrl.u32 %v572_v12, 7  ;;  %v1493_v25 = vpack.c.bf16 %v1110_v16, %v1109_v15 }
 0x115   : > { %1517 = vmatprep.subr.bf16.mxu1 %v1485_v13  ;;  %1486 = vmatprep.subr.bf16.mxu0 %v1485_v13  ;;  %v1114_v22 = vld [vmem:[%s2181_s5 + $0x48] sm:$0xff]  ;;  %v1115_v23 = vld [vmem:[%s2181_s5 + $0x50] sm:$0xff]  ;;  %v1116_v24 = vld [vmem:[%s2181_s5 + $0x58] sm:$0xff]  ;;  %v1787_v26 = vpack.c.bf16 %v1112_v19, %v1111_v18 }
 0x116   : > { %1525 = vmatpush3.bf16.msra.mxu1 %v1485_v13  ;;  %1488 = vmatpush3.bf16.msra.mxu0 %v1485_v13  ;;  %v1117_v27 = vld [vmem:[%s2181_s5 + $0x60] sm:$0xff]  ;;  %v1118_v28 = vld [vmem:[%s2181_s5 + $0x68] sm:$0xff]  ;;  %v1119_v29 = vld [vmem:[%s2181_s5 + $0x70] sm:$0xff]  ;;  %v574_v30 = vsub.s32 0, %v573_v21  ;;  %v582_v31 = vsub.s32 1, %v573_v21  ;;  %v1798_v32 = vpack.c.bf16 %v1114_v22, %v1113_v20  ;;  %v1800_v33 = vpack.c.bf16 %v1116_v24, %v1115_v23 }
 0x117   : > { %1518 = vmatprep.subr.bf16.mxu1 %v1489_v17  ;;  %1490 = vmatprep.subr.bf16.mxu0 %v1489_v17  ;;  %v1120_v34 = vld [vmem:[%s2181_s5 + $0x78] sm:$0xff]  ;;  %v566_v35 = vld [vmem:[%s2179_s3] sm:$0xff]  ;;  %v602_v36 = vsub.s32 2, %v573_v21  ;;  %v626_v37 = vsub.s32 3, %v573_v21  ;;  %v1808_v38 = vpack.c.bf16 %v1118_v28, %v1117_v27  ;;  %v634_v41 = vsub.s32 4, %v573_v21  ;;  %v1844_v59 = vld [vmem:[#allocation2 + $0x30] sm:$0xff] }
 0x118   : > { %v1810_v39 = vrot.slane %v566_v35, %v574_v30  ;;  %v1812_v40 = vrot.slane %v566_v35, %v582_v31  ;;  %v1814_v42 = vld [vmem:[#allocation2 + $0x18] sm:$0xff]  ;;  %v1816_v43 = vld [vmem:[#allocation2 + $0x20] sm:$0xff]  ;;  %v1818_v44 = vpack.c.bf16 %v1120_v34, %v1119_v29  ;;  %v653_v46 = vsub.s32 5, %v573_v21  ;;  %v1860_v1 = vld [vmem:[%s2179_s3 + $0x8] ss:$0 sm:$0xff] }
 0x119   : > { %v1820_v45 = vrot.slane %v566_v35, %v602_v36  ;;  %v676_v47 = vsub.s32 6, %v573_v21  ;;  %v1822_v48 = vrot.slane %v566_v35, %v626_v37  ;;  %v1824_v49 = vrot.slane %v566_v35, %v634_v41  ;;  %v1846_v60 = vld [vmem:[#allocation2 + $0x38] sm:$0xff]  ;;  %v1877_v22 = vld [vmem:[#allocation2 + $0x48] sm:$0xff]  ;;  %v1879_v23 = vld [vmem:[#allocation2 + $0x50] sm:$0xff] }
 0x11a   : > { %1526 = vmatpush3.bf16.msra.mxu1 %v1489_v17  ;;  %1492 = vmatpush3.bf16.msra.mxu0 %v1489_v17  ;;  %v684_v50 = vsub.s32 7, %v573_v21  ;;  %v741_v51 = vmul.f32 %v1814_v42, %v1812_v40  ;;  %v1828_v52 = vrot.slane %v566_v35, %v653_v46  ;;  %v737_v53 = vmul.f32 %v1814_v42, %v1810_v39  ;;  %v736_v29 = vld [vmem:[#allocation2 + $0x28] sm:$0x3] }
 0x11b   : > { %1519 = vmatprep.subr.bf16.mxu1 %v1493_v25  ;;  %1494 = vmatprep.subr.bf16.mxu0 %v1493_v25  ;;  %v1834_v54 = vmul.f32 %v1816_v43, %v1812_v40  ;;  %v1836_v55 = vrot.slane %v566_v35, %v676_v47  ;;  %v756_v57 = vmul.f32 %v1814_v42, %v1820_v45 }
 0x11c   : > { %v747_v56 = vrot.slane %v741_v51, 1  ;;  %v1842_v58 = vmul.f32 %v1816_v43, %v1820_v45  ;;  %v1848_v61 = vrot.slane %v566_v35, %v684_v50  ;;  %v778_v63 = vmul.f32 %v1844_v59, %v1824_v49  ;;  %v773_v35 = vld [vmem:[#allocation2 + $0x40] sm:$0x3] }
 0x11d   : > { %v748_v62 = vrot.slane %v1834_v54, 1  ;;  %v1855_v0 = vmul.f32 %v1846_v60, %v1824_v49  ;;  %v762_v2 = vrot.slane %v756_v57, 2  ;;  %v793_v12 = vmul.f32 %v1844_v59, %v1828_v52 }
 0x11e   : > { %1527 = vmatpush3.bf16.msra.mxu1 %v1493_v25  ;;  %1496 = vmatpush3.bf16.msra.mxu0 %v1493_v25  ;;  %v763_v11 = vrot.slane %v1842_v58, 2  ;;  %v1867_v13 = vmul.f32 %v1846_v60, %v1828_v52  ;;  %v774_v15 = vmul.f32 %v1844_v59, %v1822_v48  ;;  %v784_v16 = vrot.slane %v778_v63, 1 }
 0x11f   : > { %1520 = vmatprep.subr.bf16.mxu1 %v1787_v26  ;;  %1498 = vmatprep.subr.bf16.mxu0 %v1787_v26  ;;  %v749_v14 = vsel %vm590_vm2, %v747_v56, %v748_v62  ;;  %v785_v17 = vrot.slane %v1855_v0, 1  ;;  %v799_v20 = vrot.slane %v793_v12, 2  ;;  %v812_v24 = vmul.f32 %v1877_v22, %v1836_v55 }
 0x120   : > { %v754_v18 = vadd.f32 %v749_v14, %v737_v53  ;;  %v764_v19 = vsel %vm610_vm3, %v762_v2, %v763_v11  ;;  %v800_v21 = vrot.slane %v1867_v13, 2  ;;  %v816_v25 = vmul.f32 %v1877_v22, %v1848_v61  ;;  %v811_v53 = vld [vmem:[#allocation2 + $0x58] sm:$0x3] }
 0x121   : > { %v817_v27 = vmul.f32 %v1879_v23, %v1848_v61  ;;  %v831_v28 = vmul.f32 %v1860_v1, %v1877_v22  ;;  %v786_v31 = vsel %vm590_vm2, %v784_v16, %v785_v17  ;;  %v1894_v34 = vmul.f32 %v1860_v1, %v1879_v23 }
 0x122   : > { %1528 = vmatpush3.bf16.msra.mxu1 %v1787_v26  ;;  %1500 = vmatpush3.bf16.msra.mxu0 %v1787_v26  ;;  %v769_v30 = vadd.f32 %v764_v19, %v754_v18  ;;  %v801_v36 = vsel %vm610_vm3, %v799_v20, %v800_v21  ;;  %v822_v37 = vrot.slane %v816_v25, 1  ;;  %v743_v50 = vmul.f32 %v736_v29, %v1812_v40 }
 0x123   : > { %1521 = vmatprep.subr.bf16.mxu1 %v1798_v32  ;;  %1502 = vmatprep.subr.bf16.mxu0 %v1798_v32  ;;  %v823_v41 = vrot.slane %v817_v27, 1  ;;  %v837_v46 = vrot.slane %v831_v28, 2  ;;  %v838_v26 = vrot.slane %v1894_v34, 2  ;;  %v758_v51 = vmul.f32 %v736_v29, %v1820_v45 }
 0x124   : > { %v776_v47 = vadd.f32 %v774_v15, %v769_v30  ;;  %v738_v56 = vmul.f32 %v1816_v43, %v1810_v39  ;;  %v780_v57 = vmul.f32 %v773_v35, %v1824_v49  ;;  %v795_v58 = vmul.f32 %v773_v35, %v1828_v52 }
 0x125   : > { %v824_v54 = vsel %vm590_vm2, %v822_v37, %v823_v41  ;;  %v750_v0 = vrot.slane %v743_v50, 1  ;;  %v765_v2 = vrot.slane %v758_v51, 2  ;;  %v775_v12 = vmul.f32 %v1846_v60, %v1822_v48 }
 0x126   : > { %1529 = vmatpush3.bf16.msra.mxu1 %v1798_v32  ;;  %1504 = vmatpush3.bf16.msra.mxu0 %v1798_v32  ;;  %v791_v63 = vadd.f32 %v786_v31, %v776_v47  ;;  %v839_v13 = vsel %vm610_vm3, %v837_v46, %v838_v26  ;;  %v787_v14 = vrot.slane %v780_v57, 1  ;;  %v802_v15 = vrot.slane %v795_v58, 2  ;;  %v1942_v46 = vld [vmem:[%s2180_s4] ss:$0 sm:$0xff] }
 0x127   : > { %1522 = vmatprep.subr.bf16.mxu1 %v1800_v33  ;;  %1506 = vmatprep.subr.bf16.mxu0 %v1800_v33  ;;  %v818_v16 = vmul.f32 %v811_v53, %v1848_v61  ;;  %v751_v32 = vsel %vm590_vm2, %v748_v62, %v750_v0  ;;  %v766_v19 = vsel %vm610_vm3, %v763_v11, %v765_v2 }
 0x128   : > { %v806_v18 = vadd.f32 %v801_v36, %v791_v63  ;;  %v833_v20 = vmul.f32 %v1860_v1, %v811_v53  ;;  %v755_v25 = vadd.f32 %v751_v32, %v738_v56  ;;  %v788_v27 = vsel %vm590_vm2, %v785_v17, %v787_v14 }
 0x129   : > { %v813_v28 = vmul.f32 %v1879_v23, %v1836_v55  ;;  %v825_v29 = vrot.slane %v818_v16, 1  ;;  %v803_v31 = vsel %vm610_vm3, %v800_v21, %v802_v15  ;;  %v862_v62 = vmul.f32 %v1844_v59, %v1812_v40 }
 0x12a   : > { %1530 = vmatpush3.bf16.msra.mxu1 %v1800_v33  ;;  %1508 = vmatpush3.bf16.msra.mxu0 %v1800_v33  ;;  %v814_v30 = vadd.f32 %v812_v24, %v806_v18  ;;  %v770_v11 = vadd.f32 %v766_v19, %v755_v25  ;;  %v840_v17 = vrot.slane %v833_v20, 2  ;;  %v858_v35 = vmul.f32 %v1844_v59, %v1810_v39 }
 0x12b   : > { %1523 = vmatprep.subr.bf16.mxu1 %v1808_v38  ;;  %1510 = vmatprep.subr.bf16.mxu0 %v1808_v38  ;;  %v1934_v36 = vmul.f32 %v1846_v60, %v1812_v40  ;;  %v826_v24 = vsel %vm590_vm2, %v823_v41, %v825_v29  ;;  %v868_v21 = vrot.slane %v862_v62, 1  ;;  %v877_v37 = vmul.f32 %v1844_v59, %v1820_v45  ;;  %v1977_v29 = vld [vmem:[#allocation2 + $0x60] sm:$0xff] }
 0x12c   : > { %v829_v33 = vadd.f32 %v824_v54, %v814_v30  ;;  %v777_v47 = vadd.f32 %v775_v12, %v770_v11  ;;  %v1947_v51 = vmul.f32 %v1846_v60, %v1820_v45  ;;  %v895_v53 = vmul.f32 %v1877_v22, %v1822_v48  ;;  %v1979_v30 = vld [vmem:[#allocation2 + $0x68] sm:$0xff] }
 0x12d   : > { %v869_v50 = vrot.slane %v1934_v36, 1  ;;  %v883_v54 = vrot.slane %v877_v37, 2  ;;  %v899_v56 = vmul.f32 %v1877_v22, %v1824_v49  ;;  %v1957_v57 = vmul.f32 %v1879_v23, %v1824_v49 }
 0x12e   : > { %1531 = vmatpush3.bf16.msra.mxu1 %v1808_v38  ;;  %v844_v41 = vadd.f32 %v839_v13, %v829_v33  ;;  %1512 = vmatpush3.bf16.msra.mxu0 %v1808_v38  ;;  %v792_v58 = vadd.f32 %v788_v27, %v777_v47  ;;  %v884_v0 = vrot.slane %v1947_v51, 2  ;;  %v914_v38 = vmul.f32 %v1877_v22, %v1828_v52  ;;  %v894_v51 = vld [vmem:[#allocation2 + $0x58] sm:$0x3] }
 0x12f   : > { %1524 = vmatprep.subr.bf16.mxu1 %v1818_v44  ;;  %1514 = vmatprep.subr.bf16.mxu0 %v1818_v44  ;;  %v870_v63 = vsel %vm590_vm2, %v868_v21, %v869_v50  ;;  %v905_v13 = vrot.slane %v899_v56, 1  ;;  %v906_v14 = vrot.slane %v1957_v57, 1  ;;  %v915_v18 = vmul.f32 %v1879_v23, %v1828_v52  ;;  %v857_v21 = vld [vmem:[#allocation2 + $0x40] sm:$0x3] }
 0x130   : > { %v846_v2 = vadd.f32 %v1942_v46, %v844_v41  ;;  %v875_v12 = vadd.f32 %v870_v63, %v858_v35  ;;  %v807_v15 = vadd.f32 %v803_v31, %v792_v58  ;;  %v885_v16 = vsel %vm610_vm3, %v883_v54, %v884_v0 }
 0x131   : > { %v920_v32 = vrot.slane %v914_v38, 2  ;;  %v841_v20 = vsel %vm610_vm3, %v838_v26, %v840_v17  ;;  %v907_v27 = vsel %vm590_vm2, %v905_v13, %v906_v14  ;;  %v921_v62 = vrot.slane %v915_v18, 2  ;;  %v932_v38 = vld [vmem:[#allocation2 + $0x70] sm:$0x3] }
 0x132   : > { %1532 = vmatpush3.bf16.msra.mxu1 %v1818_v44  ;;  %v848_v19 = vmax.f32 %v846_v2, 0.0  ;;  %v890_v25 = vadd.f32 %v885_v16, %v875_v12  ;;  %1516 = vmatpush3.bf16.msra.mxu0 %v1818_v44  ;;  %v815_v31 = vadd.f32 %v813_v28, %v807_v15  ;;  %v937_v11 = vmul.f32 %v1977_v29, %v1848_v61 }
 0x133   : > { %v938_v35 = vmul.f32 %v1979_v30, %v1848_v61  ;;  %v952_v26 = vmul.f32 %v1860_v1, %v1977_v29  ;;  %v1990_v17 = vmul.f32 %v1860_v1, %v1979_v30  ;;  %v922_v44 = vsel %vm610_vm3, %v920_v32, %v921_v62 }
 0x134   : > { %v850_v34 = vmin.f32 %v848_v19, 6.0  ;;  %v897_v33 = vadd.f32 %v895_v53, %v890_v25  ;;  %v830_v37 = vadd.f32 %v826_v24, %v815_v31  ;;  %v943_v28 = vrot.slane %v937_v11, 1 }
 0x135   : > { %v944_v47 = vrot.slane %v938_v35, 1  ;;  %v933_v54 = vmul.f32 %v1977_v29, %v1836_v55  ;;  %v958_v53 = vrot.slane %v952_v26, 2  ;;  %v959_v56 = vrot.slane %v1990_v17, 2  ;;  %v569_v26 = vld [vmem:[#allocation2] sm:$0xff] }
 0x136   : > { %1476 = vmatprep.mubr.f32.mxu1 %v850_v34  ;;  %v912_v41 = vadd.f32 %v907_v27, %v897_v33  ;;  %v845_v57 = vadd.f32 %v841_v20, %v830_v37  ;;  %v859_v58 = vmul.f32 %v1846_v60, %v1810_v39  ;;  %v864_v63 = vmul.f32 %v857_v21, %v1812_v40 }
 0x137   : > { %v879_v24 = vmul.f32 %v857_v21, %v1820_v45  ;;  %v945_v12 = vsel %vm590_vm2, %v943_v28, %v944_v47  ;;  %v960_v13 = vsel %vm610_vm3, %v958_v53, %v959_v56  ;;  %v901_v15 = vmul.f32 %v894_v51, %v1824_v49  ;;  %v570_v28 = vld [vmem:[#allocation2 + $0x8] sm:$0xff] }
 0x138   : > { %v927_v2 = vadd.f32 %v922_v44, %v912_v41  ;;  %v847_v16 = vadd.f32 %v1942_v46, %v845_v57  ;;  %v871_v18 = vrot.slane %v864_v63, 1  ;;  %v916_v19 = vmul.f32 %v894_v51, %v1828_v52 }
 0x139   : > { %v886_v32 = vrot.slane %v879_v24, 2  ;;  %v896_v25 = vmul.f32 %v1879_v23, %v1822_v48  ;;  %v908_v27 = vrot.slane %v901_v15, 1  ;;  %v939_v31 = vmul.f32 %v932_v38, %v1848_v61 }
 0x13a   : > { %v935_v20 = vadd.f32 %v933_v54, %v927_v2  ;;  %v849_v11 = vmax.f32 %v847_v16, 0.0  ;;  %v872_v35 = vsel %vm590_vm2, %v869_v50, %v871_v18  ;;  %v923_v33 = vrot.slane %v916_v19, 2 }
 0x13b   : > { %v887_v34 = vsel %vm610_vm3, %v884_v0, %v886_v32  ;;  %v876_v21 = vadd.f32 %v872_v35, %v859_v58  ;;  %v934_v37 = vmul.f32 %v1979_v30, %v1836_v55  ;;  %v946_v44 = vrot.slane %v939_v31, 1 }
 0x13c   : > { %v950_v17 = vadd.f32 %v945_v12, %v935_v20  ;;  %v851_v51 = vmin.f32 %v849_v11, 6.0  ;;  %v909_v41 = vsel %vm590_vm2, %v906_v14, %v908_v27  ;;  %v924_v54 = vsel %vm610_vm3, %v921_v62, %v923_v33 }
 0x13d   : > { %v954_v36 = vmul.f32 %v1860_v1, %v932_v38  ;;  %v891_v50 = vadd.f32 %v887_v34, %v876_v21  ;;  %v576_v0 = vmul.f32 %v1810_v39, %v569_v26  ;;  %v584_v57 = vmul.f32 %v1812_v40, %v569_v26 }
 0x13e   : > { %v965_v53 = vadd.f32 %v960_v13, %v950_v17  ;;  %1477 = vmatmul.mubr.f32.vlgmr.msra.gmra.mrb[0].mxu1 %v851_v51  ;;  %v947_v58 = vsel %vm590_vm2, %v944_v47, %v946_v44  ;;  %v585_v63 = vmul.f32 %v1812_v40, %v570_v28  ;;  %v604_v24 = vmul.f32 %v1820_v45, %v569_v26 }
 0x13f   : > { %v2023_v2 = vmul.f32 %v1820_v45, %v570_v28  ;;  %v898_v62 = vadd.f32 %v896_v25, %v891_v50  ;;  %v961_v38 = vrot.slane %v954_v36, 2  ;;  %v591_v12 = vrot.slane %v584_v57, 1  ;;  %v571_v50 = vld [vmem:[#allocation2 + $0x10] sm:$0x3] }
 0x140   : > { %v967_v14 = vadd.f32 %v1942_v46, %v965_v53  ;;  %v592_v13 = vrot.slane %v585_v63, 1  ;;  %v611_v15 = vrot.slane %v604_v24, 2  ;;  %v628_v18 = vmul.f32 %v1814_v42, %v1822_v48 }
 0x141   : > { %v612_v16 = vrot.slane %v2023_v2, 2  ;;  %v913_v32 = vadd.f32 %v909_v41, %v898_v62  ;;  %v636_v19 = vmul.f32 %v1814_v42, %v1824_v49  ;;  %v637_v20 = vmul.f32 %v1816_v43, %v1824_v49 }
 0x142   : > { %v969_v47 = vmax.f32 %v967_v14, 0.0  ;;  %v593_v27 = vsel %vm590_vm2, %v591_v12, %v592_v13  ;;  %v655_v31 = vmul.f32 %v1814_v42, %v1828_v52  ;;  %v656_v11 = vmul.f32 %v1816_v43, %v1828_v52  ;;  %v623_v14 = vld [vmem:[#allocation2 + $0x28] sm:$0x3] }
 0x143   : > { %v613_v25 = vsel %vm610_vm3, %v611_v15, %v612_v16  ;;  %v928_v34 = vadd.f32 %v924_v54, %v913_v32  ;;  %v598_v33 = vadd.f32 %v593_v27, %v576_v0  ;;  %v642_v26 = vrot.slane %v636_v19, 1 }
 0x144   : > { %v971_v35 = vmin.f32 %v969_v47, 6.0  ;;  %v962_v17 = vsel %vm610_vm3, %v959_v56, %v961_v38  ;;  %v643_v21 = vrot.slane %v637_v20, 1  ;;  %v661_v44 = vrot.slane %v655_v31, 2  ;;  %v673_v20 = vld [vmem:[#allocation2 + $0x40] sm:$0x3] }
 0x145   : > { %v662_v51 = vrot.slane %v656_v11, 2  ;;  %v936_v41 = vadd.f32 %v934_v37, %v928_v34  ;;  %v618_v36 = vadd.f32 %v613_v25, %v598_v33  ;;  %v686_v53 = vmul.f32 %v1844_v59, %v1848_v61 }
 0x146   : > { %1479 = vmatprep.mubr.f32.mxu1 %v971_v35  ;;  %v687_v42 = vmul.f32 %v1846_v60, %v1848_v61  ;;  %v644_v57 = vsel %vm590_vm2, %v642_v26, %v643_v21  ;;  %v678_v54 = vmul.f32 %v1844_v59, %v1836_v55  ;;  %v705_v56 = vmul.f32 %v1860_v1, %v1844_v59 }
 0x147   : > { %v2051_v0 = vmul.f32 %v1860_v1, %v1846_v60  ;;  %v951_v37 = vadd.f32 %v947_v58, %v936_v41  ;;  %v630_v63 = vadd.f32 %v628_v18, %v618_v36  ;;  %v692_v24 = vrot.slane %v686_v53, 1 }
 0x148   : > { %v693_v2 = vrot.slane %v687_v42, 1  ;;  %v663_v62 = vsel %vm610_vm3, %v661_v44, %v662_v51  ;;  %v711_v38 = vrot.slane %v705_v56, 2  ;;  %v586_v15 = vmul.f32 %v1812_v40, %v571_v50 }
 0x149   : > { %v712_v12 = vrot.slane %v2051_v0, 2  ;;  %v966_v47 = vadd.f32 %v962_v17, %v951_v37  ;;  %v649_v32 = vadd.f32 %v644_v57, %v630_v63  ;;  %v577_v59 = vmul.f32 %v1810_v39, %v570_v28 }
 0x14a   : > { %v606_v19 = vmul.f32 %v1820_v45, %v571_v50  ;;  %v694_v58 = vsel %vm590_vm2, %v692_v24, %v693_v2  ;;  %v594_v27 = vrot.slane %v586_v15, 1  ;;  %v638_v25 = vmul.f32 %v1824_v49, %v623_v14 }
 0x14b   : > { %v713_v18 = vsel %vm610_vm3, %v711_v38, %v712_v12  ;;  %v968_v31 = vadd.f32 %v1942_v46, %v966_v47  ;;  %v668_v11 = vadd.f32 %v663_v62, %v649_v32  ;;  %v657_v34 = vmul.f32 %v1828_v52, %v623_v14 }
 0x14c   : > { %v614_v35 = vrot.slane %v606_v19, 2  ;;  %v595_v28 = vsel %vm590_vm2, %v592_v13, %v594_v27  ;;  %v629_v33 = vmul.f32 %v1816_v43, %v1822_v48  ;;  %v645_v26 = vrot.slane %v638_v25, 1 }
 0x14d   : > { %v688_v17 = vmul.f32 %v1848_v61, %v673_v20  ;;  %v970_v44 = vmax.f32 %v968_v31, 0.0  ;;  %v680_v41 = vadd.f32 %v678_v54, %v668_v11  ;;  %v599_v36 = vadd.f32 %v595_v28, %v577_v59 }
 0x14e   : > { %v615_v53 = vsel %vm610_vm3, %v612_v16, %v614_v35  ;;  %v664_v42 = vrot.slane %v657_v34, 2  ;;  %v679_v50 = vmul.f32 %v1846_v60, %v1836_v55  ;;  %v707_v56 = vmul.f32 %v1860_v1, %v673_v20  ;;  %v1051_v34 = vld [vmem:[#allocation2 + $0x78] sm:$0xff] }
 0x14f   : > { %v695_v57 = vrot.slane %v688_v17, 1  ;;  %v972_v37 = vmin.f32 %v970_v44, 6.0  ;;  %v699_v13 = vadd.f32 %v694_v58, %v680_v41  ;;  %v619_v63 = vadd.f32 %v615_v53, %v599_v36  ;;  %v1052_v44 = vld [vmem:[#allocation2 + $0x80] sm:$0xff] }
 0x150   : > { %v646_v43 = vsel %vm590_vm2, %v643_v21, %v645_v26  ;;  %v665_v24 = vsel %vm610_vm3, %v662_v51, %v664_v42  ;;  %v979_v54 = vmul.f32 %v1877_v22, %v1810_v39  ;;  %v983_v16 = vmul.f32 %v1877_v22, %v1812_v40 }
 0x151   : > { %v696_v14 = vsel %vm590_vm2, %v693_v2, %v695_v57  ;;  %1480 = vmatmul.mubr.f32.gmra.mrb[2].mxu1 %v972_v37  ;;  %v718_v60 = vadd.f32 %v713_v18, %v699_v13  ;;  %v631_v62 = vadd.f32 %v629_v33, %v619_v63  ;;  %v984_v38 = vmul.f32 %v1879_v23, %v1812_v40  ;;  %v978_v37 = vld [vmem:[#allocation2 + $0x58] sm:$0x3] }
 0x152   : > { %v998_v15 = vmul.f32 %v1877_v22, %v1820_v45  ;;  %v714_v21 = vrot.slane %v707_v56, 2  ;;  %v989_v47 = vrot.slane %v983_v16, 1  ;;  %v999_v51 = vmul.f32 %v1879_v23, %v1820_v45 }
 0x153   : > { %v1016_v2 = vmul.f32 %v1977_v29, %v1822_v48  ;;  %v726_v32 = vadd.f32 %v1942_v46, %v718_v60  ;;  %v650_v59 = vadd.f32 %v646_v43, %v631_v62  ;;  %v990_v19 = vrot.slane %v984_v38, 1 }
 0x154   : > { %v1004_v20 = vrot.slane %v998_v15, 2  ;;  %v1005_v58 = vrot.slane %v999_v51, 2  ;;  %v1020_v18 = vmul.f32 %v1977_v29, %v1824_v49  ;;  %v2093_v22 = vmul.f32 %v1979_v30, %v1824_v49 }
 0x155   : > { %v1035_v27 = vmul.f32 %v1977_v29, %v1828_v52  ;;  %v728_v25 = vmax.f32 %v726_v32, 0.0  ;;  %v669_v31 = vadd.f32 %v665_v24, %v650_v59  ;;  %v991_v11 = vsel %vm590_vm2, %v989_v47, %v990_v19 }
 0x156   : > { %v1036_v35 = vmul.f32 %v1979_v30, %v1828_v52  ;;  %v996_v28 = vadd.f32 %v991_v11, %v979_v54  ;;  %v1006_v33 = vsel %vm610_vm3, %v1004_v20, %v1005_v58  ;;  %v1026_v26 = vrot.slane %v1020_v18, 1 }
 0x157   : > { %v1027_v17 = vrot.slane %v2093_v22, 1  ;;  %v730_v41 = vmin.f32 %v728_v25, 6.0  ;;  %v681_v36 = vadd.f32 %v679_v50, %v669_v31  ;;  %v1041_v53 = vrot.slane %v1035_v27, 2  ;;  %v1053_v25 = vld [vmem:[#allocation2 + $0x88] sm:$0x3] }
 0x158   : > { %v1042_v42 = vrot.slane %v1036_v35, 2  ;;  %v715_v29 = vsel %vm610_vm3, %v712_v12, %v714_v21  ;;  %v1011_v57 = vadd.f32 %v1006_v33, %v996_v28  ;;  %v1058_v56 = vmul.f32 %v1051_v34, %v1848_v61  ;;  %v1015_v12 = vld [vmem:[#allocation2 + $0x70] sm:$0x3] }
 0x159   : > { %1473 = vmatprep.mubr.f32.mxu0 %v730_v41  ;;  %v700_v13 = vadd.f32 %v696_v14, %v681_v36  ;;  %v1028_v63 = vsel %vm590_vm2, %v1026_v26, %v1027_v17  ;;  %v1059_v43 = vmul.f32 %v1052_v44, %v1848_v61  ;;  %v1073_v24 = vmul.f32 %v1860_v1, %v1051_v34 }
 0x15a   : > { %v1018_v54 = vadd.f32 %v1016_v2, %v1011_v57  ;;  %v1043_v50 = vsel %vm610_vm3, %v1041_v53, %v1042_v42  ;;  %v1054_v16 = vmul.f32 %v1051_v34, %v1836_v55  ;;  %v1074_v0 = vmul.f32 %v1860_v1, %v1052_v44 }
 0x15b   : > { %v719_v60 = vadd.f32 %v715_v29, %v700_v13  ;;  %v1064_v62 = vrot.slane %v1058_v56, 1  ;;  %v1065_v38 = vrot.slane %v1059_v43, 1  ;;  %v985_v15 = vmul.f32 %v978_v37, %v1812_v40 }
 0x15c   : > { %v1033_v14 = vadd.f32 %v1028_v63, %v1018_v54  ;;  %v1079_v21 = vrot.slane %v1073_v24, 2  ;;  %v980_v47 = vmul.f32 %v1879_v23, %v1810_v39  ;;  %v1000_v51 = vmul.f32 %v978_v37, %v1820_v45 }
 0x15d   : > { %v727_v2 = vadd.f32 %v1942_v46, %v719_v60  ;;  %v1080_v32 = vrot.slane %v1074_v0, 2  ;;  %v992_v59 = vrot.slane %v985_v15, 1  ;;  %v1022_v20 = vmul.f32 %v1015_v12, %v1824_v49 }
 0x15e   : > { %v1048_v18 = vadd.f32 %v1043_v50, %v1033_v14  ;;  %v1007_v22 = vrot.slane %v1000_v51, 2  ;;  %v1037_v27 = vmul.f32 %v1015_v12, %v1828_v52  ;;  %v1066_v40 = vsel %vm590_vm2, %v1064_v62, %v1065_v38 }
 0x15f   : > { %v729_v31 = vmax.f32 %v727_v2, 0.0  ;;  %v993_v11 = vsel %vm590_vm2, %v990_v19, %v992_v59  ;;  %v1029_v35 = vrot.slane %v1022_v20, 1  ;;  %v1017_v34 = vmul.f32 %v1979_v30, %v1822_v48 }
 0x160   : > { %v1056_v39 = vadd.f32 %v1054_v16, %v1048_v18  ;;  %v997_v23 = vadd.f32 %v993_v11, %v980_v47  ;;  %v1008_v45 = vsel %vm610_vm3, %v1005_v58, %v1007_v22  ;;  %v1081_v49 = vsel %vm610_vm3, %v1079_v21, %v1080_v32 }
 0x161   : > { %v731_v28 = vmin.f32 %v729_v31, 6.0  ;;  %v1044_v33 = vrot.slane %v1037_v27, 2  ;;  %v1060_v52 = vmul.f32 %v1053_v25, %v1848_v61  ;;  %v1030_v36 = vsel %vm590_vm2, %v1027_v17, %v1029_v35 }
 0x162   : > { %v1071_v26 = vadd.f32 %v1066_v40, %v1056_v39  ;;  %v1012_v41 = vadd.f32 %v1008_v45, %v997_v23  ;;  %v1075_v19 = vmul.f32 %v1860_v1, %v1053_v25  ;;  %v1055_v56 = vmul.f32 %v1052_v44, %v1836_v55  ;;  %v1379_v55 = vld [vmem:[%s2182_s6] ss:$0 sm:$0xff] }
 0x163   : > { %1474 = vmatmul.mubr.f32.vlgmr.msra.gmra.mrb[12].mxu0 %v731_v28  ;;  %v1045_v58 = vsel %vm610_vm3, %v1042_v42, %v1044_v33  ;;  %v1067_v57 = vrot.slane %v1060_v52, 1 }
 0x164   : > { %v1086_v53 = vadd.f32 %v1081_v49, %v1071_v26  ;;  %v1019_v29 = vadd.f32 %v1017_v34, %v1012_v41  ;;  %v1082_v37 = vrot.slane %v1075_v19, 2 }
 0x165   : > { %v1068_v63 = vsel %vm590_vm2, %v1065_v38, %v1067_v57 }
 0x166   : > { %v1088_v48 = vadd.f32 %v1942_v46, %v1086_v53  ;;  %v1034_v30 = vadd.f32 %v1030_v36, %v1019_v29  ;;  %v1083_v1 = vsel %vm610_vm3, %v1080_v32, %v1082_v37 }
 0x168   : > { %v1090_v13 = vmax.f32 %v1088_v48, 0.0  ;;  %v1049_v61 = vadd.f32 %v1045_v58, %v1034_v30 }
 0x16a   : > { %v1092_v43 = vmin.f32 %v1090_v13, 6.0  ;;  %v1057_v24 = vadd.f32 %v1055_v56, %v1049_v61 }
 0x16c   : > { %1482 = vmatprep.mubr.f32.mxu1 %v1092_v43  ;;  %v1072_v17 = vadd.f32 %v1068_v63, %v1057_v24 }
 0x16e   : > { %v1087_v42 = vadd.f32 %v1083_v1, %v1072_v17 }
 0x170   : > { %v1089_v54 = vadd.f32 %v1942_v46, %v1087_v42 }
 0x172   : > { %v1091_v50 = vmax.f32 %v1089_v54, 0.0 }
 0x174   : > { %v1093_v16 = vmin.f32 %v1091_v50, 6.0 }
 0x176   : > { %1483 = vmatmul.mubr.f32.gmra.mrb[4].mxu1 %v1093_v16 }
 0x211   : > { %v1478_v44 = vpop.f32.mrb[0].mxu1 }
 0x212   : > { %v1210_v0 = vadd.f32 %v1478_v44, %v1379_v55  ;;  %v1204_v12 = vpop.f32.mrb[1].mxu1 }
 0x213   : > { %v1205_v60 = vadd.f32 %v1379_v55, %v1204_v12 }
 0x214   : > { %v1236_v62 = vadd.f32 %v1210_v0, %v1724_v6 }
 0x215   : > { %v1235_v38 = vadd.f32 %v1205_v60, %v1718_v5 }
 0x216   : > { %1244 = vst.msk [vmem:[%s1704_s21 + $0x18] sm:$0xff] %vm337_vm1, %v1236_v62 }
 0x217   : > { %1243 = vst.msk [vmem:[%s1704_s21 + $0x10] sm:$0xff] %vm337_vm1, %v1235_v38 }
 0x224   : > { %v1481_v46 = vpop.f32.mrb[2].mxu1 }
 0x225   : > { %v1220_v15 = vadd.f32 %v1481_v46, %v1379_v55  ;;  %v1214_v14 = vpop.f32.mrb[3].mxu1 }
 0x226   : > { %v1215_v21 = vadd.f32 %v1379_v55, %v1214_v14 }
 0x227   : > { %v1238_v47 = vadd.f32 %v1220_v15, %v1732_v8 }
 0x228   : > { %v1237_v51 = vadd.f32 %v1215_v21, %v1726_v7 }
 0x229   : > { %1246 = vst.msk [vmem:[%s1704_s21 + $0x28] sm:$0xff] %vm337_vm1, %v1238_v47 }
 0x22a   : > { %1245 = vst.msk [vmem:[%s1704_s21 + $0x20] sm:$0xff] %vm337_vm1, %v1237_v51 }
 0x236   : > { %v1475_v5 = vpop.f32.mrb[12].mxu0 }
 0x237   : > { %v1200_v6 = vadd.f32 %v1475_v5, %v1379_v55  ;;  %v1194_v2 = vpop.f32.mrb[13].mxu0 }
 0x238   : > { %v1195_v32 = vadd.f32 %v1379_v55, %v1194_v2 }
 0x239   : > { %v1234_v59 = vadd.f32 %v1200_v6, %v1716_v4 }
 0x23a   : > { %v1233_v20 = vadd.f32 %v1195_v32, %v1710_v3 }
 0x23b   : > { %1242 = vst.msk [vmem:[%s1704_s21 + $0x8] sm:$0xff] %vm337_vm1, %v1234_v59 }
 0x23c   : > { %1241 = vst.msk [vmem:[%s1704_s21] sm:$0xff] %vm337_vm1, %v1233_v20 }
 0x249   : > { %v1484_v8 = vpop.f32.mrb[4].mxu1 }
 0x24a   : > { %v1230_v7 = vadd.f32 %v1484_v8, %v1379_v55  ;;  %v1224_v18 = vpop.f32.mrb[5].mxu1 }
 0x24b   : > { %v1225_v22 = vadd.f32 %v1379_v55, %v1224_v18 }
 0x24c   : > { %v1240_v27 = vadd.f32 %v1230_v7, %v1740_v10 }
 0x24d   : > { %v1239_v25 = vadd.f32 %v1225_v22, %v1734_v9 }
 0x24e   : > { %1248 = vst.msk [vmem:[%s1704_s21 + $0x38] sm:$0xff] %vm337_vm1, %v1240_v27 }
 0x24f   : > { %1247 = vst.msk [vmem:[%s1704_s21 + $0x30] sm:$0xff] %vm337_vm1, %v1239_v25 }
 0x250 PF: > { %s17_s28 = sadd.s32 1, %s1614_s28   ;;  %s2187_s14 = sld [smem:[#allocation4_spill]] }
 0x251   : > { %p14_p11 = scmp.ge.s32.totalorder %s17_s28, 10   ;;  %s2188_s24 = smov %s1606_s26 }
 0x252   : > { %s2189_s25 = smov %s1610_s27  ;;  %s2190_s26 = smov %s2193_s29 }
 0x253   :  { %16 = sbr.rel (!%p14_p11) target bundleno = 3 (0x3), region = 98 }
 0x256   : > { %s2191_s27 = smov %s2187_s14 }

</bundles_post_ra>
